<compile_context>
chip_gen: v5e
topology: v5e:2x2
jax: 0.10.0
libtpu: 0.0.40
codegen_flags: <defaults>
</compile_context>

<pallas_src>
import math

import numpy as np

import jax
import jax.numpy as jnp
from jax.experimental import pallas as pl
from jax.experimental.pallas import tpu as pltpu

D_MODEL = 32
N_HEAD = 4
SEQ = 8
BATCH = 2
EPS = 1e-5  # torch.nn.LayerNorm default


def _layernorm_t(vT, w_col, b_col):
    """LayerNorm over features of a feature-major (D, N) slab (reduce over sublanes)."""
    mu = jnp.mean(vT, axis=0, keepdims=True)
    var = jnp.mean((vT - mu) ** 2, axis=0, keepdims=True)
    return (vT - mu) * jax.lax.rsqrt(var + EPS) * w_col + b_col


def _rab_kernel(x_ref, p_ref, o_ref):
    # x_ref/o_ref: (D, N) feature-major activations; p_ref: (13D + N_pad, 4D) packed params
    D, N = x_ref.shape
    H = N_HEAD
    hd = D // H

    # ---- static unpack of the single parameter slab (all offsets sublane-aligned) ----
    w_proj = p_ref[0:D, :]                   # (D, 4D)  c_proj.weight        (native)
    w_fc = p_ref[D:5 * D, 0:D]               # (4D, D)  c_fc.weight          (native)
    w_qkv = p_ref[5 * D:8 * D, 0:D]          # (3D, D)  in_proj_weight (q rows pre-scaled)
    w_out = p_ref[8 * D:9 * D, 0:D]          # (D, D)   out_proj.weight      (native)
    vecs = p_ref[9 * D:13 * D, 0:8]          # (4D, 8)  column-packed bias / LN vectors
    b_fc = vecs[:, 0:1]                      # (4D, 1)
    b_qkv = vecs[0:3 * D, 1:2]               # (3D, 1)  (q part pre-scaled)
    ln1_w = vecs[0:D, 2:3]
    ln1_b = vecs[0:D, 3:4]
    ln2_w = vecs[0:D, 4:5]
    ln2_b = vecs[0:D, 5:6]
    b_out = vecs[0:D, 6:7]
    b_proj = vecs[0:D, 7:8]
    attn_b = p_ref[13 * D:13 * D + N, 0:N]   # (N, N) additive bias: batch-block mask

    xT = x_ref[...].astype(jnp.float32)      # (D, N)

    # ---- attention branch (feature-major; weights in native (out, in) orientation) ----
    h1T = _layernorm_t(xT, ln1_w, ln1_b)                                      # (D, N)
    qkvT = jnp.dot(w_qkv, h1T, preferred_element_type=jnp.float32) + b_qkv    # (3D, N)

    # Heads become the leading (batch) dim via free sublane-split reshapes — no masked
    # 8-lane slices / concatenates.
    k_r = qkvT[D:2 * D, :].reshape(H, hd, N)                                  # (H, hd, N)
    v_r = qkvT[2 * D:3 * D, :].reshape(H, hd, N)                              # (H, hd, N)
    # q additionally needs tokens-major layout (contract hd on the minor dim for the MXU):
    # H aligned sublane-block XLU transposes, statically unrolled (H is tiny & fixed).
    q_h = jnp.stack(
        [qkvT[h * hd:(h + 1) * hd, :].T for h in range(H)], axis=0)           # (H, N, hd)

    # scores[h, i, j] = sum_d q[h,i,d] * k[h,d,j]   (single leading batch dim for Mosaic)
    scores = jnp.einsum('hqd,hdk->hqk', q_h, k_r,
                        preferred_element_type=jnp.float32)                    # (H, N, N)
    scores = scores + attn_b                # block-diagonal additive mask (batch separation)

    scores = scores - jnp.max(scores, axis=-1, keepdims=True)
    probs = jnp.exp(scores)
    probs = probs * pl.reciprocal(jnp.sum(probs, axis=-1, keepdims=True),
                                  approx=True)                                 # EUP recip

    # ctxT[h, d, i] = sum_j v[h,d,j] * p[h,i,j]; heads merge back along sublanes for free.
    ctxT = jnp.einsum('hdk,hqk->hdq', v_r, probs,
                      preferred_element_type=jnp.float32).reshape(D, N)        # (D, N)
    attn_outT = jnp.dot(w_out, ctxT, preferred_element_type=jnp.float32) + b_out

    x1T = xT + attn_outT                                                       # residual 1

    # ---- MLP branch: Linear(D,4D) -> QuickGELU -> Linear(4D,D), still feature-major ----
    h2T = _layernorm_t(x1T, ln2_w, ln2_b)
    hidT = jnp.dot(w_fc, h2T, preferred_element_type=jnp.float32) + b_fc       # (4D, N)
    hidT = hidT * jax.nn.sigmoid(1.702 * hidT)                                 # QuickGELU
    mlpT = jnp.dot(w_proj, hidT, preferred_element_type=jnp.float32) + b_proj  # (D, N)

    o_ref[...] = (x1T + mlpT).astype(o_ref.dtype)                              # residual 2


def _pack_params(p, n_tokens, batch):
    """Repack everything into ONE slab -> a single parameter DMA stream.

    The kernel is feature-major, so every weight stays in its native PyTorch
    (out_features, in_features) orientation.  Slab layout (width = 4D lanes):
      rows [0 , 1D)        : c_proj.weight        (D , 4D)
      rows [1D, 5D)        : c_fc.weight          (4D, D)
      rows [5D, 8D)        : attn.in_proj_weight  (3D, D)  (q rows pre-scaled by 1/sqrt(hd))
      rows [8D, 9D)        : attn.out_proj.weight (D , D)
      rows [9D, 13D)       : column-packed bias / LayerNorm vectors (4D, 8)
      rows [13D, 13D+Npad) : (N, N) additive attention bias (batch-block mask)
    """
    D = p["w_out"].shape[0]
    W = 4 * D
    hd = D // N_HEAD
    scale = 1.0 / math.sqrt(hd)

    w_qkv = p["w_qkv"].at[:D].multiply(scale)              # fold q scaling into projection
    b_qkv = p["b_qkv"].reshape(-1).at[:D].multiply(scale)

    def pad2(a, rows, cols):
        return jnp.pad(a, ((0, rows - a.shape[0]), (0, cols - a.shape[1])))

    def col(v):
        v = jnp.asarray(v).reshape(-1, 1)
        return jnp.pad(v, ((0, W - v.shape[0]), (0, 0)))

    vecs = jnp.concatenate(
        [col(p["b_fc"]), col(b_qkv), col(p["ln1_w"]), col(p["ln1_b"]),
         col(p["ln2_w"]), col(p["ln2_b"]), col(p["b_out"]), col(p["b_proj"])],
        axis=1)                                            # (4D, 8)

    # Additive mask: tokens are laid out n = s*B + b, so same-batch <=> same index mod B.
    n = n_tokens
    tok = np.arange(n)
    same = (tok[:, None] % batch) == (tok[None, :] % batch)
    bias = np.where(same, 0.0, -1e30).astype(np.float32)
    n_pad = ((n + 7) // 8) * 8
    bias = jnp.asarray(np.pad(bias, ((0, n_pad - n), (0, 0))))

    slab = jnp.concatenate([
        p["w_proj"],                         # (D, 4D)
        pad2(p["w_fc"], 4 * D, W),           # (4D, W)
        pad2(w_qkv, 3 * D, W),               # (3D, W)
        pad2(p["w_out"], D, W),              # (D , W)
        pad2(vecs, 4 * D, W),                # (4D, W)
        pad2(bias, n_pad, W),                # (Npad, W)
    ], axis=0)
    return slab


def residual_attention_block(x_sbd, params):
    """x_sbd: (S, B, D) float32 — same (seq, batch, dim) convention as the PyTorch module."""
    S, B, D = x_sbd.shape
    assert D % N_HEAD == 0, "d_model must be divisible by n_head"
    N = S * B

    slab = _pack_params(params, N, B)

    # Host-side (free, XLA): feature-major (D, N) activation slab, token n = s*B + b.
    x_t = x_sbd.reshape(N, D).T

    out_t = pl.pallas_call(
        _rab_kernel,
        grid=(1,),  # whole problem in one step; tile tokens over a "parallel" axis at real sizes
        in_specs=[
            pl.BlockSpec((D, N), lambda i: (0, 0)),
            pl.BlockSpec(slab.shape, lambda i: (0, 0)),
        ],
        out_specs=pl.BlockSpec((D, N), lambda i: (0, 0)),
        out_shape=jax.ShapeDtypeStruct((D, N), x_sbd.dtype),
        compiler_params=pltpu.CompilerParams(dimension_semantics=("arbitrary",)),
    )(x_t, slab)

    return out_t.T.reshape(S, B, D)


def init_params(key, d_model, n_head):
    del n_head
    ks = jax.random.split(key, 8)
    s = 0.05
    f32 = jnp.float32
    return {
        # LayerNorm params (stored as (1, D))
        "ln1_w": jnp.ones((1, d_model), f32),
        "ln1_b": jnp.zeros((1, d_model), f32),
        "ln2_w": jnp.ones((1, d_model), f32),
        "ln2_b": jnp.zeros((1, d_model), f32),
        # nn.MultiheadAttention: in_proj_weight (3D, D), in_proj_bias (3D,), out_proj (D, D)+(D,)
        "w_qkv": s * jax.random.normal(ks[0], (3 * d_model, d_model), f32),
        "b_qkv": s * jax.random.normal(ks[1], (1, 3 * d_model), f32),
        "w_out": s * jax.random.normal(ks[2], (d_model, d_model), f32),
        "b_out": s * jax.random.normal(ks[3], (1, d_model), f32),
        # MLP: c_fc (4D, D)+(4D,), c_proj (D, 4D)+(D,)
        "w_fc": s * jax.random.normal(ks[4], (4 * d_model, d_model), f32),
        "b_fc": s * jax.random.normal(ks[5], (1, 4 * d_model), f32),
        "w_proj": s * jax.random.normal(ks[6], (d_model, 4 * d_model), f32),
        "b_proj": s * jax.random.normal(ks[7], (1, d_model), f32),
    }


def reference(x, p):
    """Pure-JAX reference matching PyTorch semantics (S, B, D)."""
    S, B, D = x.shape
    H = N_HEAD
    hd = D // H

    def ln(v, w, b):
        mu = v.mean(-1, keepdims=True)
        var = ((v - mu) ** 2).mean(-1, keepdims=True)
        return (v - mu) / jnp.sqrt(var + EPS) * w + b

    h1 = ln(x, p["ln1_w"].reshape(D), p["ln1_b"].reshape(D))
    qkv = h1 @ p["w_qkv"].T + p["b_qkv"].reshape(3 * D)
    q, k, v = jnp.split(qkv, 3, axis=-1)

    def heads(t):
        return t.reshape(S, B, H, hd).transpose(1, 2, 0, 3)   # (B, H, S, hd)

    qh = heads(q) / math.sqrt(hd)
    kh = heads(k)
    vh = heads(v)
    scores = jnp.einsum("bhqd,bhkd->bhqk", qh, kh)
    probs = jax.nn.softmax(scores, axis=-1)
    ctx = jnp.einsum("bhqk,bhkd->bhqd", probs, vh).transpose(2, 0, 1, 3).reshape(S, B, D)
    attn_out = ctx @ p["w_out"].T + p["b_out"].reshape(D)
    x1 = x + attn_out

    h2 = ln(x1, p["ln2_w"].reshape(D), p["ln2_b"].reshape(D))
    hid = h2 @ p["w_fc"].T + p["b_fc"].reshape(4 * D)
    hid = hid * jax.nn.sigmoid(1.702 * hid)
    mlp = hid @ p["w_proj"].T + p["b_proj"].reshape(D)
    return x1 + mlp


if __name__ == "__main__":
    key = jax.random.PRNGKey(0)
    kx, kp = jax.random.split(key)

    x = jax.random.normal(kx, (SEQ, BATCH, D_MODEL), jnp.float32)   # (S, B, D)
    params = init_params(kp, D_MODEL, N_HEAD)

    out = residual_attention_block(x, params)
    out = jax.block_until_ready(out)

    ref = reference(x, params)
    assert out.shape == (SEQ, BATCH, D_MODEL)
    # tolerance slack only for the EUP approximate reciprocal in the softmax denominator
    assert jnp.allclose(out, ref, atol=1e-3, rtol=1e-3), (
        f"max abs err {jnp.max(jnp.abs(out - ref))}")

    print("KERNEL_OK")
</pallas_src>

<mosaic_0001>
module attributes {stable_mosaic.version = 11 : i64} {
  func.func @_rab_kernel(%arg0: i32, %arg1: memref<32x16xf32, #tpu.memory_space<vmem>>, %arg2: memref<432x128xf32, #tpu.memory_space<vmem>>, %arg3: memref<32x16xf32, #tpu.memory_space<vmem>>) attributes {dimension_semantics = [#tpu.dimension_semantics<arbitrary>], iteration_bounds = array<i64: 1>, scalar_prefetch = 0 : i64, scratch_operands = 0 : i64, tpu.core_type = #tpu.core_type<tc>, window_params = [{pipeline_mode = #tpu.pipeline_mode<synchronous>, transform_indices = @transform_0, window_bounds = array<i64: 32, 16>}, {pipeline_mode = #tpu.pipeline_mode<synchronous>, transform_indices = @transform_1, window_bounds = array<i64: 432, 128>}, {pipeline_mode = #tpu.pipeline_mode<synchronous>, transform_indices = @transform_2, window_bounds = array<i64: 32, 16>}]} {
    %c0 = arith.constant 0 : index
    %c0_0 = arith.constant 0 : index
    %0 = vector.load %arg2[%c0, %c0_0] : memref<432x128xf32, #tpu.memory_space<vmem>>, vector<32x128xf32>
    %c32 = arith.constant 32 : index
    %c0_1 = arith.constant 0 : index
    %1 = vector.load %arg2[%c32, %c0_1] : memref<432x128xf32, #tpu.memory_space<vmem>>, vector<128x32xf32>
    %c160 = arith.constant 160 : index
    %c0_2 = arith.constant 0 : index
    %2 = vector.load %arg2[%c160, %c0_2] : memref<432x128xf32, #tpu.memory_space<vmem>>, vector<96x32xf32>
    %c256 = arith.constant 256 : index
    %c0_3 = arith.constant 0 : index
    %3 = vector.load %arg2[%c256, %c0_3] : memref<432x128xf32, #tpu.memory_space<vmem>>, vector<32x32xf32>
    %c288 = arith.constant 288 : index
    %c0_4 = arith.constant 0 : index
    %4 = vector.load %arg2[%c288, %c0_4] : memref<432x128xf32, #tpu.memory_space<vmem>>, vector<128x8xf32>
    %5 = vector.extract_strided_slice %4 {offsets = [0, 0], sizes = [128, 1], strides = [1, 1]} : vector<128x8xf32> to vector<128x1xf32>
    %6 = vector.extract_strided_slice %4 {offsets = [0, 1], sizes = [96, 1], strides = [1, 1]} : vector<128x8xf32> to vector<96x1xf32>
    %7 = vector.extract_strided_slice %4 {offsets = [0, 2], sizes = [32, 1], strides = [1, 1]} : vector<128x8xf32> to vector<32x1xf32>
    %8 = vector.extract_strided_slice %4 {offsets = [0, 3], sizes = [32, 1], strides = [1, 1]} : vector<128x8xf32> to vector<32x1xf32>
    %9 = vector.extract_strided_slice %4 {offsets = [0, 4], sizes = [32, 1], strides = [1, 1]} : vector<128x8xf32> to vector<32x1xf32>
    %10 = vector.extract_strided_slice %4 {offsets = [0, 5], sizes = [32, 1], strides = [1, 1]} : vector<128x8xf32> to vector<32x1xf32>
    %11 = vector.extract_strided_slice %4 {offsets = [0, 6], sizes = [32, 1], strides = [1, 1]} : vector<128x8xf32> to vector<32x1xf32>
    %12 = vector.extract_strided_slice %4 {offsets = [0, 7], sizes = [32, 1], strides = [1, 1]} : vector<128x8xf32> to vector<32x1xf32>
    %c416 = arith.constant 416 : index
    %c0_5 = arith.constant 0 : index
    %13 = vector.load %arg2[%c416, %c0_5] : memref<432x128xf32, #tpu.memory_space<vmem>>, vector<16x16xf32>
    %c0_6 = arith.constant 0 : index
    %c0_7 = arith.constant 0 : index
    %14 = vector.load %arg1[%c0_6, %c0_7] : memref<32x16xf32, #tpu.memory_space<vmem>>, vector<32x16xf32>
    %cst = arith.constant dense<0.000000e+00> : vector<16xf32>
    %15 = vector.multi_reduction <add>, %14, %cst [0] : vector<32x16xf32> to vector<16xf32>
    %16 = vector.shape_cast %15 : vector<16xf32> to vector<1x16xf32>
    %cst_8 = arith.constant 3.200000e+01 : f32
    %17 = vector.broadcast %cst_8 : f32 to vector<1x16xf32>
    %18 = arith.divf %16, %17 : vector<1x16xf32>
    %19 = vector.broadcast %18 : vector<1x16xf32> to vector<32x16xf32>
    %20 = arith.subf %14, %19 : vector<32x16xf32>
    %21 = arith.mulf %20, %20 : vector<32x16xf32>
    %cst_9 = arith.constant dense<0.000000e+00> : vector<16xf32>
    %22 = vector.multi_reduction <add>, %21, %cst_9 [0] : vector<32x16xf32> to vector<16xf32>
    %23 = vector.shape_cast %22 : vector<16xf32> to vector<1x16xf32>
    %cst_10 = arith.constant 3.200000e+01 : f32
    %24 = vector.broadcast %cst_10 : f32 to vector<1x16xf32>
    %25 = arith.divf %23, %24 : vector<1x16xf32>
    %26 = vector.broadcast %18 : vector<1x16xf32> to vector<32x16xf32>
    %27 = arith.subf %14, %26 : vector<32x16xf32>
    %cst_11 = arith.constant 9.99999974E-6 : f32
    %28 = vector.broadcast %cst_11 : f32 to vector<1x16xf32>
    %29 = arith.addf %25, %28 : vector<1x16xf32>
    %30 = math.rsqrt %29 : vector<1x16xf32>
    %31 = vector.broadcast %30 : vector<1x16xf32> to vector<32x16xf32>
    %32 = arith.mulf %27, %31 : vector<32x16xf32>
    %33 = vector.broadcast %7 : vector<32x1xf32> to vector<32x16xf32>
    %34 = arith.mulf %32, %33 : vector<32x16xf32>
    %35 = vector.broadcast %8 : vector<32x1xf32> to vector<32x16xf32>
    %36 = arith.addf %34, %35 : vector<32x16xf32>
    %cst_12 = arith.constant dense<0.000000e+00> : vector<96x16xf32>
    %37 = tpu.matmul %2, %36, %cst_12 {dimension_numbers = #tpu.dot_dimension_numbers<[1], [0], [0], [1], [0, 0, 1, 1], [], []>} : vector<96x32xf32>, vector<32x16xf32>, vector<96x16xf32> -> vector<96x16xf32>
    %38 = vector.broadcast %6 : vector<96x1xf32> to vector<96x16xf32>
    %39 = arith.addf %37, %38 : vector<96x16xf32>
    %40 = vector.extract_strided_slice %39 {offsets = [32, 0], sizes = [32, 16], strides = [1, 1]} : vector<96x16xf32> to vector<32x16xf32>
    %41 = vector.shape_cast %40 : vector<32x16xf32> to vector<4x8x16xf32>
    %42 = vector.extract_strided_slice %39 {offsets = [64, 0], sizes = [32, 16], strides = [1, 1]} : vector<96x16xf32> to vector<32x16xf32>
    %43 = vector.shape_cast %42 : vector<32x16xf32> to vector<4x8x16xf32>
    %44 = vector.extract_strided_slice %39 {offsets = [0, 0], sizes = [8, 16], strides = [1, 1]} : vector<96x16xf32> to vector<8x16xf32>
    %45 = tpu.transpose %44, [1, 0] : vector<8x16xf32> -> vector<16x8xf32>
    %46 = vector.extract_strided_slice %39 {offsets = [8, 0], sizes = [8, 16], strides = [1, 1]} : vector<96x16xf32> to vector<8x16xf32>
    %47 = tpu.transpose %46, [1, 0] : vector<8x16xf32> -> vector<16x8xf32>
    %48 = vector.extract_strided_slice %39 {offsets = [16, 0], sizes = [8, 16], strides = [1, 1]} : vector<96x16xf32> to vector<8x16xf32>
    %49 = tpu.transpose %48, [1, 0] : vector<8x16xf32> -> vector<16x8xf32>
    %50 = vector.extract_strided_slice %39 {offsets = [24, 0], sizes = [8, 16], strides = [1, 1]} : vector<96x16xf32> to vector<8x16xf32>
    %51 = tpu.transpose %50, [1, 0] : vector<8x16xf32> -> vector<16x8xf32>
    %52 = vector.shape_cast %45 : vector<16x8xf32> to vector<1x16x8xf32>
    %53 = vector.shape_cast %47 : vector<16x8xf32> to vector<1x16x8xf32>
    %54 = vector.shape_cast %49 : vector<16x8xf32> to vector<1x16x8xf32>
    %55 = vector.shape_cast %51 : vector<16x8xf32> to vector<1x16x8xf32>
    %56 = tpu.concatenate %52, %53, %54, %55 in 0 : vector<1x16x8xf32>, vector<1x16x8xf32>, vector<1x16x8xf32>, vector<1x16x8xf32> -> vector<4x16x8xf32>
    "tpu.trace_start"() <{level = 10 : i32, message = "hqd,hdk->hqk"}> : () -> ()
    %cst_13 = arith.constant dense<0.000000e+00> : vector<4x16x16xf32>
    %57 = tpu.matmul %56, %41, %cst_13 {dimension_numbers = #tpu.dot_dimension_numbers<[2], [1], [1], [2], [0, 0, 0, 1, 1, 2], [0], [0]>} : vector<4x16x8xf32>, vector<4x8x16xf32>, vector<4x16x16xf32> -> vector<4x16x16xf32>
    "tpu.trace_stop"() : () -> ()
    %58 = vector.shape_cast %13 : vector<16x16xf32> to vector<1x16x16xf32>
    %59 = vector.broadcast %58 : vector<1x16x16xf32> to vector<4x16x16xf32>
    %60 = arith.addf %57, %59 : vector<4x16x16xf32>
    %cst_14 = arith.constant dense<0xFF800000> : vector<4x16xf32>
    %61 = vector.multi_reduction <maximumf>, %60, %cst_14 [2] : vector<4x16x16xf32> to vector<4x16xf32>
    %62 = vector.shape_cast %61 : vector<4x16xf32> to vector<4x16x1xf32>
    %63 = vector.broadcast %62 : vector<4x16x1xf32> to vector<4x16x16xf32>
    %64 = arith.subf %60, %63 : vector<4x16x16xf32>
    %65 = math.exp %64 : vector<4x16x16xf32>
    %cst_15 = arith.constant dense<0.000000e+00> : vector<4x16xf32>
    %66 = vector.multi_reduction <add>, %65, %cst_15 [2] : vector<4x16x16xf32> to vector<4x16xf32>
    %67 = vector.shape_cast %66 : vector<4x16xf32> to vector<4x16x1xf32>
    %68 = tpu.reciprocal %67 {approx = true} : vector<4x16x1xf32> -> vector<4x16x1xf32>
    %69 = vector.broadcast %68 : vector<4x16x1xf32> to vector<4x16x16xf32>
    %70 = arith.mulf %65, %69 : vector<4x16x16xf32>
    "tpu.trace_start"() <{level = 10 : i32, message = "hdk,hqk->hdq"}> : () -> ()
    %cst_16 = arith.constant dense<0.000000e+00> : vector<4x8x16xf32>
    %71 = tpu.matmul %43, %70, %cst_16 {dimension_numbers = #tpu.dot_dimension_numbers<[2], [2], [1], [1], [0, 0, 0, 1, 1, 1], [0], [0]>} : vector<4x8x16xf32>, vector<4x16x16xf32>, vector<4x8x16xf32> -> vector<4x8x16xf32>
    "tpu.trace_stop"() : () -> ()
    %72 = vector.shape_cast %71 : vector<4x8x16xf32> to vector<32x16xf32>
    %cst_17 = arith.constant dense<0.000000e+00> : vector<32x16xf32>
    %73 = tpu.matmul %3, %72, %cst_17 {dimension_numbers = #tpu.dot_dimension_numbers<[1], [0], [0], [1], [0, 0, 1, 1], [], []>} : vector<32x32xf32>, vector<32x16xf32>, vector<32x16xf32> -> vector<32x16xf32>
    %74 = vector.broadcast %11 : vector<32x1xf32> to vector<32x16xf32>
    %75 = arith.addf %73, %74 : vector<32x16xf32>
    %76 = arith.addf %14, %75 : vector<32x16xf32>
    %cst_18 = arith.constant dense<0.000000e+00> : vector<16xf32>
    %77 = vector.multi_reduction <add>, %76, %cst_18 [0] : vector<32x16xf32> to vector<16xf32>
    %78 = vector.shape_cast %77 : vector<16xf32> to vector<1x16xf32>
    %cst_19 = arith.constant 3.200000e+01 : f32
    %79 = vector.broadcast %cst_19 : f32 to vector<1x16xf32>
    %80 = arith.divf %78, %79 : vector<1x16xf32>
    %81 = vector.broadcast %80 : vector<1x16xf32> to vector<32x16xf32>
    %82 = arith.subf %76, %81 : vector<32x16xf32>
    %83 = arith.mulf %82, %82 : vector<32x16xf32>
    %cst_20 = arith.constant dense<0.000000e+00> : vector<16xf32>
    %84 = vector.multi_reduction <add>, %83, %cst_20 [0] : vector<32x16xf32> to vector<16xf32>
    %85 = vector.shape_cast %84 : vector<16xf32> to vector<1x16xf32>
    %cst_21 = arith.constant 3.200000e+01 : f32
    %86 = vector.broadcast %cst_21 : f32 to vector<1x16xf32>
    %87 = arith.divf %85, %86 : vector<1x16xf32>
    %88 = vector.broadcast %80 : vector<1x16xf32> to vector<32x16xf32>
    %89 = arith.subf %76, %88 : vector<32x16xf32>
    %cst_22 = arith.constant 9.99999974E-6 : f32
    %90 = vector.broadcast %cst_22 : f32 to vector<1x16xf32>
    %91 = arith.addf %87, %90 : vector<1x16xf32>
    %92 = math.rsqrt %91 : vector<1x16xf32>
    %93 = vector.broadcast %92 : vector<1x16xf32> to vector<32x16xf32>
    %94 = arith.mulf %89, %93 : vector<32x16xf32>
    %95 = vector.broadcast %9 : vector<32x1xf32> to vector<32x16xf32>
    %96 = arith.mulf %94, %95 : vector<32x16xf32>
    %97 = vector.broadcast %10 : vector<32x1xf32> to vector<32x16xf32>
    %98 = arith.addf %96, %97 : vector<32x16xf32>
    %cst_23 = arith.constant dense<0.000000e+00> : vector<128x16xf32>
    %99 = tpu.matmul %1, %98, %cst_23 {dimension_numbers = #tpu.dot_dimension_numbers<[1], [0], [0], [1], [0, 0, 1, 1], [], []>} : vector<128x32xf32>, vector<32x16xf32>, vector<128x16xf32> -> vector<128x16xf32>
    %100 = vector.broadcast %5 : vector<128x1xf32> to vector<128x16xf32>
    %101 = arith.addf %99, %100 : vector<128x16xf32>
    %cst_24 = arith.constant 1.702000e+00 : f32
    %102 = vector.broadcast %cst_24 : f32 to vector<128x16xf32>
    %103 = arith.mulf %102, %101 : vector<128x16xf32>
    %104 = arith.negf %103 : vector<128x16xf32>
    %105 = math.exp %104 : vector<128x16xf32>
    %cst_25 = arith.constant 1.000000e+00 : f32
    %106 = vector.broadcast %cst_25 : f32 to vector<128x16xf32>
    %107 = arith.addf %106, %105 : vector<128x16xf32>
    %108 = arith.divf %106, %107 : vector<128x16xf32>
    %109 = arith.mulf %101, %108 : vector<128x16xf32>
    %cst_26 = arith.constant dense<0.000000e+00> : vector<32x16xf32>
    %110 = tpu.matmul %0, %109, %cst_26 {dimension_numbers = #tpu.dot_dimension_numbers<[1], [0], [0], [1], [0, 0, 1, 1], [], []>} : vector<32x128xf32>, vector<128x16xf32>, vector<32x16xf32> -> vector<32x16xf32>
    %111 = vector.broadcast %12 : vector<32x1xf32> to vector<32x16xf32>
    %112 = arith.addf %110, %111 : vector<32x16xf32>
    %113 = arith.addf %76, %112 : vector<32x16xf32>
    %c0_27 = arith.constant 0 : index
    %c0_28 = arith.constant 0 : index
    %114 = vector.load %arg3[%c0_27, %c0_28] : memref<32x16xf32, #tpu.memory_space<vmem>>, vector<32x16xf32>
    tpu.vector_store %arg3[%c0_27, %c0_28], %113 {strides = array<i32>} : memref<32x16xf32, #tpu.memory_space<vmem>>, vector<32x16xf32>,
    return
  }
  func.func @transform_0(%arg0: i32) -> (i32, i32) {
    %c0_i32 = arith.constant 0 : i32
    %c0_i32_0 = arith.constant 0 : i32
    %c0_i32_1 = arith.constant 0 : i32
    return %c0_i32, %c0_i32_0 : i32, i32
  }
  func.func @transform_1(%arg0: i32) -> (i32, i32) {
    %c0_i32 = arith.constant 0 : i32
    %c0_i32_0 = arith.constant 0 : i32
    %c0_i32_1 = arith.constant 0 : i32
    return %c0_i32, %c0_i32_0 : i32, i32
  }
  func.func @transform_2(%arg0: i32) -> (i32, i32) {
    %c0_i32 = arith.constant 0 : i32
    %c0_i32_0 = arith.constant 0 : i32
    %c0_i32_1 = arith.constant 0 : i32
    return %c0_i32, %c0_i32_0 : i32, i32
  }
}

</mosaic_0001>

<bundles_post_ra>
// kernel: tpu_custom_call.1
= control target key start
LH: loop header
LB: loop body
LE: loop exit
PB: predicated region body
PF: predicated region fallthrough
CT: control target
= control target key end

     0   :  { %7 = vsyncpa [#allocation3], 0  ;;  %s1751_s12 = smov [#allocation2]   ;;  %s1752_s14 = smov 128   ;;  %s2525_s0 = inlined_call_operand.vmem [shape: f32[32,16], index: 0, kind: input, shape index: {}]   ;;  %s2526_s1 = inlined_call_operand.hbm [shape: f32[432,128], index: 1, kind: input, shape index: {}]   ;;  %s2527_s2 = inlined_call_operand.vmem [shape: f32[32,16], index: 2, kind: output, shape index: {}]  }
   0x1   :  { %s14_s11 = sshll.u32 %s2526_s1, 4  ;;  %s16_s13 = sshll.u32 %s1751_s12, 4  ;;  %s15_s11 = int_to_ptr.hbm [resolvable:$true] %s14_s11  ;;  %s17_s13 = int_to_ptr.vmem [resolvable:$true] %s16_s13 }
   0x2   :  { %s1753_s15 = smov 8  }
   0x3   :  { %22 = dma.hbm_to_vmem [thread:$0]  %s15_s11, 6912, %s17_s13, [#allocation3], %s1752_s14, %s1752_s14, %s1753_s15  }
   0x4   :  { %1749 = dma.done.wait [#allocation3], 6912  }
   0x5   :  { %1750 = vsyncadd [#allocation3], 4294960384  ;;  %v1754_v0 = vmov 2   ;;  %v1755_v1 = vmov 3   ;;  %v1756_v2 = vmov 32.0   ;;  %vm85_vm0 = vcmask 130048  }
   0x6   :  { %1596 = vset.pattern.permute.xlu0 %v1754_v0  ;;  %1597 = vset.pattern.permute.xlu1 %v1755_v1  ;;  %1619 = vrcp.f32 %v1756_v2  ;;  %v1781_v4 = vld [vmem:[#allocation2 + $0x138] sm:$0xff]  ;;  %v1785_v5 = vld [vmem:[#allocation2 + $0x130] sm:$0xff]  ;;  %v1790_v6 = vld [vmem:[%s2525_s0] sm:$0xff]  ;;  %v1757_v60 = vmov 1   ;;  %vm244_vm5 = vcmask 261120   ;;  %vm462_vm6 = vcmask 64512  }
   0x7   :  { %1599 = vset.pattern.permute.xlu2 %v1755_v1  ;;  %161 = vperm.xlu0 %1596, %v1781_v4   ;;  %v1795_v7 = vld [vmem:[%s2525_s0 + $0x8] sm:$0xff]  ;;  %v1801_v8 = vld [vmem:[%s2525_s0 + $0x10] sm:$0xff]  ;;  %v1806_v9 = vld [vmem:[%s2525_s0 + $0x18] sm:$0xff]  ;;  %v86_v10 = vsel %vm85_vm0, %v1790_v6, 0.0 }
   0x8   :  { %181 = vperm.xlu1 %1597, %v1781_v4   ;;  %177 = vperm.xlu2 %1599, %v1785_v5   ;;  %v87_v11 = vsel %vm85_vm0, %v1795_v7, 0.0  ;;  %v89_v14 = vsel %vm85_vm0, %v1801_v8, 0.0  ;;  %v91_v15 = vsel %vm85_vm0, %v1806_v9, 0.0  ;;  %v1816_v18 = vld [vmem:[#allocation2 + $0x128] sm:$0xff]  ;;  %v1820_v21 = vld [vmem:[#allocation2 + $0x120] sm:$0xff] }
   0x9   :  { %v88_v13 = vadd.f32 %v87_v11, %v86_v10  ;;  %v1841_v11 = vld [vmem:[#allocation2 + $0x140] sm:$0xff] }
   0xb   :  { %v90_v16 = vadd.f32 %v89_v14, %v88_v13 }
   0xc   :  { %v1620_v3 = vpop.eup %1619 }
   0xd   :  { %v100_v12 = vmul.f32 32.0, %v1620_v3  ;;  %v92_v19 = vadd.f32 %v91_v15, %v90_v16  ;;  %vm104_vm1 = vweird.f32 %v1620_v3 }
   0xf   :  { %v101_v17 = vsub.f32 1.0, %v100_v12  ;;  %156 = vperm.xlu0 %1596, %v1785_v5   ;;  %v93_v20 = vrot.slane %v92_v19, 4  ;;  %v1843_v12 = vld [vmem:[#allocation2 + $0x150] sm:$0xff] }
  0x10   :  { %1598 = vset.pattern.permute.xlu1 %v1754_v0  ;;  %1600 = vset.pattern.permute.xlu2 %v1754_v0 }
  0x11   :  { %151 = vperm.xlu1 %1598, %v1816_v18   ;;  %v102_v22 = vmul.f32 %v1620_v3, %v101_v17  ;;  %146 = vperm.xlu2 %1600, %v1820_v21   ;;  %v94_v23 = vadd.f32 %v93_v20, %v92_v19 }
  0x13   :  { %v95_v24 = vrot.slane %v94_v23, 2  ;;  %v103_v25 = vadd.f32 %v1620_v3, %v102_v22 }
  0x15   :  { %v96_v26 = vadd.f32 %v95_v24, %v94_v23  ;;  %v1824_v28 = vsel %vm104_vm1, %v1620_v3, %v103_v25  ;;  %v1847_v23 = vld [vmem:[#allocation2 + $0x148] sm:$0xff] }
  0x17   :  { %1601 = vset.pattern.permute.xlu0 %v1755_v1  ;;  %v97_v27 = vrot.slane %v96_v26, 1 }
  0x18   :  { %173 = vperm.xlu0 %1601, %v1816_v18  }
  0x19   :  { %1602 = vset.pattern.permute.xlu1 %v1755_v1  ;;  %v98_v29 = vadd.f32 %v97_v27, %v96_v26  ;;  %1603 = vset.pattern.permute.xlu2 %v1757_v60 }
  0x1a   :  { %169 = vperm.xlu1 %1602, %v1820_v21   ;;  %189 = vperm.xlu2 %1603, %v1820_v21  }
  0x1b   :  { %v106_v30 = vmul.f32 %v1824_v28, %v98_v29 }
  0x1d   :  { %v107_v31 = vsub.f32 %v1790_v6, %v106_v30  ;;  %v108_v32 = vsub.f32 %v1795_v7, %v106_v30  ;;  %v109_v33 = vsub.f32 %v1801_v8, %v106_v30  ;;  %v110_v36 = vsub.f32 %v1806_v9, %v106_v30  ;;  %v47_v30 = vld [vmem:[#allocation2 + $0xa0] sm:$0xff] }
  0x1f   :  { %v111_v34 = vmul.f32 %v107_v31, %v107_v31  ;;  %v112_v35 = vmul.f32 %v108_v32, %v108_v32  ;;  %v113_v37 = vmul.f32 %v109_v33, %v109_v33  ;;  %v114_v41 = vmul.f32 %v110_v36, %v110_v36 }
  0x20   :  { %1605 = vset.pattern.permute.xlu0 %v1757_v60 }
  0x21   :  { %v115_v38 = vsel %vm85_vm0, %v111_v34, 0.0  ;;  %v116_v39 = vsel %vm85_vm0, %v112_v35, 0.0  ;;  %v118_v42 = vsel %vm85_vm0, %v113_v37, 0.0  ;;  %v120_v44 = vsel %vm85_vm0, %v114_v41, 0.0  ;;  %197 = vperm.xlu0 %1605, %v1785_v5   ;;  %v50_v34 = vld [vmem:[#allocation2 + $0xb8] sm:$0xff]  ;;  %v51_v35 = vld [vmem:[#allocation2 + $0xc0] sm:$0xff] }
  0x22   :  { %v117_v40 = vadd.f32 %v116_v39, %v115_v38  ;;  %1604 = vset.pattern.permute.xlu1 %v1757_v60  ;;  %206 = vperm.xlu2 %1603, %v1841_v11   ;;  %v53_v37 = vld [vmem:[#allocation2 + $0xd0] sm:$0xff]  ;;  %v54_v38 = vld [vmem:[#allocation2 + $0xd8] sm:$0xff] }
  0x23   :  { %193 = vperm.xlu1 %1604, %v1816_v18  }
  0x24   :  { %v119_v43 = vadd.f32 %v118_v42, %v117_v40 }
  0x26   :  { %v121_v45 = vadd.f32 %v120_v44, %v119_v43 }
  0x28   :  { %v122_v46 = vrot.slane %v121_v45, 4 }
  0x2a   :  { %v123_v47 = vadd.f32 %v122_v46, %v121_v45  ;;  %211 = vperm.xlu2 %1603, %v1847_v23  }
  0x2b   :  { %201 = vperm.xlu1 %1604, %v1781_v4  }
  0x2c   :  { %v124_v48 = vrot.slane %v123_v47, 2 }
  0x2e   :  { %v125_v49 = vadd.f32 %v124_v48, %v123_v47 }
  0x30   :  { %v126_v50 = vrot.slane %v125_v49, 1 }
  0x32   :  { %v127_v51 = vadd.f32 %v126_v50, %v125_v49 }
  0x33   :  { %216 = vperm.xlu1 %1604, %v1843_v12  }
  0x34   :  { %v128_v52 = vmul.f32 %v127_v51, %v1824_v28 }
  0x36   :  { %v129_v53 = vadd.f32 1e-05, %v128_v52 }
  0x38   :  { %1621 = vrsqrt.f32 %v129_v53  ;;  %vm136_vm2 = vweird.f32 %v129_v53 }
  0x3e   :  { %v1622_v54 = vpop.eup %1621 }
  0x3f   :  { %v131_v55 = vmul.f32 %v1622_v54, %v129_v53  ;;  %vm137_vm3 = vweird.f32 %v1622_v54 }
  0x40   :  { %vm138_vm4 = vmor %vm136_vm2, %vm137_vm3 }
  0x41   :  { %v132_v56 = vmul.f32 %v1622_v54, %v131_v55 }
  0x43   :  { %v133_v57 = vmul.f32 0.5, %v132_v56 }
  0x45   :  { %v134_v58 = vsub.f32 1.5, %v133_v57 }
  0x47   :  { %v135_v59 = vmul.f32 %v1622_v54, %v134_v58 }
  0x49   :  { %v139_v61 = vsel %vm138_vm4, %v1622_v54, %v135_v59 }
  0x4a   :  { %v143_v62 = vmul.f32 %v139_v61, %v110_v36  ;;  %v142_v10 = vmul.f32 %v139_v61, %v109_v33  ;;  %v140_v17 = vmul.f32 %v139_v61, %v107_v31  ;;  %v141_v19 = vmul.f32 %v139_v61, %v108_v32  ;;  %v1851_v31 = vld [vmem:[#allocation2 + $0x158] sm:$0xff]  ;;  %v48_v32 = vld [vmem:[#allocation2 + $0xa8] sm:$0xff]  ;;  %v49_v33 = vld [vmem:[#allocation2 + $0xb0] sm:$0xff] }
  0x4b   :  { %221 = vperm.xlu2 %1603, %v1851_v31   ;;  %v52_v36 = vld [vmem:[#allocation2 + $0xc8] sm:$0xff] }
  0x62   :  { %v178_v2 = vpop.permute.xlu2 %177 }
  0x6b   :  { %v147_v20 = vpop.permute.xlu2 %146 }
  0x6c   :  { %v164_v22 = vmul.f32 %v147_v20, %v140_v17  ;;  %v79_v17 = vld [vmem:[#allocation2 + $0x1a0] sm:$0xff] }
  0x74   :  { %v190_v39 = vpop.permute.xlu2 %189 }
  0x79   :  { %v162_v63 = vpop.permute.xlu0 %161 }
  0x7a   :  { %v182_v0 = vpop.permute.xlu1 %181  ;;  %v167_v1 = vmul.f32 %v162_v63, %v143_v62 }
  0x7c   :  { %v187_v3 = vadd.f32 %v182_v0, %v167_v1  ;;  %v207_v51 = vpop.permute.xlu2 %206 }
  0x7e   :  { %293 = vmatpush.msra.mxu0 %v187_v3 }
  0x81   :  { %v157_v13 = vpop.permute.xlu0 %156 }
  0x82   :  { %v166_v14 = vmul.f32 %v157_v13, %v142_v10 }
  0x83   :  { %v152_v15 = vpop.permute.xlu1 %151 }
  0x84   :  { %v186_v16 = vadd.f32 %v178_v2, %v166_v14  ;;  %v165_v24 = vmul.f32 %v152_v15, %v141_v19  ;;  %v212_v54 = vpop.permute.xlu2 %211  ;;  %v55_v15 = vld [vmem:[#allocation2 + $0xe0] sm:$0xff] }
  0x86   :  { %294 = vmatpush.msra.mxu0 %v186_v16  ;;  %v56_v16 = vld [vmem:[#allocation2 + $0xe8] sm:$0xff] }
  0x8a   :  { %v174_v25 = vpop.permute.xlu0 %173 }
  0x8b   :  { %v185_v26 = vadd.f32 %v174_v25, %v165_v24  ;;  %v80_v24 = vld [vmem:[#allocation2 + $0x1a8] sm:$0xff] }
  0x8c   :  { %v170_v27 = vpop.permute.xlu1 %169 }
  0x8d   :  { %v184_v29 = vadd.f32 %v170_v27, %v164_v22  ;;  %295 = vmatpush.msra.mxu0 %v185_v26 }
  0x8f   :  { %296 = vmatpush.msra.mxu0 %v184_v29 }
  0x90   :  { %1510 = vmatmul.msk.f32.vlgmr.msra.gmra.mxu0 %vm244_vm5, %v47_v30 }
  0x93   :  { %v198_v45 = vpop.permute.xlu0 %197 }
  0x95   :  { %v194_v42 = vpop.permute.xlu1 %193 }
  0x98   :  { %1511 = vmatmul.msk.f32.gmra.mxu0 %vm244_vm5, %v48_v32 }
  0x9d   :  { %v202_v48 = vpop.permute.xlu1 %201 }
  0xa0   :  { %1512 = vmatmul.msk.f32.gmra.mxu0 %vm244_vm5, %v49_v33 }
  0xa5   :  { %v217_v57 = vpop.permute.xlu1 %216  ;;  %v222_v60 = vpop.permute.xlu2 %221 }
  0xa8   :  { %1513 = vmatmul.msk.f32.gmra.mxu0 %vm244_vm5, %v50_v34 }
  0xb0   :  { %1514 = vmatmul.msk.f32.gmra.mxu0 %vm244_vm5, %v51_v35 }
  0xb8   :  { %1515 = vmatmul.msk.f32.gmra.mxu0 %vm244_vm5, %v52_v36 }
  0xc0   :  { %1516 = vmatmul.msk.f32.gmra.mxu0 %vm244_vm5, %v53_v37 }
  0xc8   :  { %1517 = vmatmul.msk.f32.gmra.mxu0 %vm244_vm5, %v54_v38 }
  0xd0   :  { %1518 = vmatmul.msk.f32.gmra.mxu0 %vm244_vm5, %v55_v15 }
  0xd8   :  { %1519 = vmatmul.msk.f32.gmra.mxu0 %vm244_vm5, %v56_v16 }
 0x10d   :  { %v298_v40 = vpop.f32.mrf.mxu0 }
 0x10e   :  { %v299_v41 = vadd.f32 %v298_v40, %v190_v39 }
 0x110   :  { %334 = vxpose.xlu0.b32.start.end [1/1] (short) (narrow) %v299_v41, 16 }
 0x115   :  { %v301_v43 = vpop.f32.mrf.mxu0 }
 0x116   :  { %v302_v44 = vadd.f32 %v301_v43, %v194_v42 }
 0x118   :  { %366 = vxpose.xlu1.b32.start.end [1/1] (short) (narrow) %v302_v44, 16 }
 0x11d   :  { %v304_v46 = vpop.f32.mrf.mxu0 }
 0x11e   :  { %v305_v47 = vadd.f32 %v304_v46, %v198_v45  ;;  %v1878_v46 = vld [vmem:[#allocation2 + $0x168] sm:$0xff] }
 0x120   :  { %398 = vxpose.xlu2.b32.start.end [1/1] (short) (narrow) %v305_v47, 16 }
 0x125   :  { %v307_v49 = vpop.f32.mrf.mxu0 }
 0x126   :  { %v308_v50 = vadd.f32 %v307_v49, %v202_v48 }
 0x128   :  { %430 = vxpose.xlu0.b32.start.end [1/1] (short) (narrow) %v308_v50, 16 }
 0x12d   :  { %v310_v52 = vpop.f32.mrf.mxu0 }
 0x12e   :  { %v311_v53 = vadd.f32 %v310_v52, %v207_v51  ;;  %v57_v52 = vld [vmem:[#allocation2 + $0xf0] sm:$0xff] }
 0x12f   :  { %1520 = vmatmul.msk.f32.gmra.mxu0 %vm244_vm5, %v57_v52 }
 0x130   :  { %484 = vmatpush.msra.mxu1 %v311_v53 }
 0x135   :  { %v313_v55 = vpop.f32.mrf.mxu0 }
 0x136   :  { %v314_v56 = vadd.f32 %v313_v55, %v212_v54 }
 0x138   :  { %513 = vmatpush.msrb.mxu1 %v314_v56  ;;  %1578 = vmatpush.msra.mxu2 %v314_v56 }
 0x13d   :  { %v316_v58 = vpop.f32.mrf.mxu0 }
 0x13e   :  { %v317_v59 = vadd.f32 %v316_v58, %v217_v57  ;;  %v58_v57 = vld [vmem:[#allocation2 + $0xf8] sm:$0xff] }
 0x13f   :  { %1521 = vmatmul.msk.f32.gmra.mxu0 %vm244_vm5, %v58_v57 }
 0x140   :  { %542 = vmatpush.msra.mxu3 %v317_v59 }
 0x145   :  { %v319_v61 = vpop.f32.mrf.mxu0 }
 0x146   :  { %v320_v62 = vadd.f32 %v319_v61, %v222_v60 }
 0x1b4   :  { %v350_v63 = vpop.trf.xlu0 }
 0x1b5   :  { %1522 = vmatmul.msk.f32.vlgmr.msra.gmra.mxu1 %vm462_vm6, %v350_v63 }
 0x1b6   :  { %571 = vmatpush.msra.mxu1 %v320_v62 }
 0x1b9   :  { %v414_v0 = vpop.trf.xlu2 }
 0x1ba   :  { %1526 = vmatmul.msk.f32.vlgmr.msra.gmra.mxu3 %vm462_vm6, %v414_v0 }
 0x1bc   :  { %v382_v1 = vpop.trf.xlu1  ;;  %v351_v2 = vpop.trf.xlu0 }
 0x1bd   :  { %1523 = vmatmul.msk.f32.gmra.mxu1 %vm462_vm6, %v351_v2 }
 0x1c1   :  { %v415_v3 = vpop.trf.xlu2 }
 0x1c2   :  { %1527 = vmatmul.msk.f32.gmra.mxu3 %vm462_vm6, %v415_v3 }
 0x1c4   :  { %v383_v10 = vpop.trf.xlu1 }
 0x1c5   :  { %1524 = vmatmul.msk.f32.vlgmr.msrb.gmra.mxu1 %vm462_vm6, %v382_v1  ;;  %1525 = vmatmul.msk.f32.vlgmr.msra.gmra.mxu2 %vm462_vm6, %v383_v10 }
 0x1cc   :  { %v446_v13 = vpop.trf.xlu0 }
 0x1cd   :  { %1528 = vmatmul.msk.f32.vlgmr.msra.gmra.mxu1 %vm462_vm6, %v446_v13 }
 0x1d4   :  { %v447_v14 = vpop.trf.xlu0 }
 0x1d5   :  { %1529 = vmatmul.msk.f32.gmra.mxu1 %vm462_vm6, %v447_v14 }
 0x232   :  { %v486_v19 = vpop.f32.mrf.mxu1 }
 0x233   :  { %v487_v20 = vadd.f32 %v486_v19, %v79_v17 }
 0x235   :  { %v579_v22 = vsel %vm85_vm0, %v487_v20, -inf }
 0x236   :  { %580 = vmax.xlane.f32.xlu1 %v579_v22 }
 0x23a   :  { %v489_v25 = vpop.f32.mrf.mxu1 }
 0x23b   :  { %v490_v26 = vadd.f32 %v489_v25, %v80_v24 }
 0x23d   :  { %v582_v27 = vsel %vm85_vm0, %v490_v26, -inf  ;;  %v544_v29 = vpop.f32.mrf.mxu3 }
 0x23e   :  { %583 = vmax.xlane.f32.xlu0 %v582_v27  ;;  %v545_v30 = vadd.f32 %v544_v29, %v79_v17 }
 0x240   :  { %v591_v34 = vsel %vm85_vm0, %v545_v30, -inf }
 0x242   :  { %v515_v32 = vpop.f32.mrf.mxu1 }
 0x243   :  { %v516_v33 = vadd.f32 %v515_v32, %v79_v17 }
 0x245   :  { %v585_v35 = vsel %vm85_vm0, %v516_v33, -inf  ;;  %v547_v36 = vpop.f32.mrf.mxu3 }
 0x246   :  { %586 = vmax.xlane.f32.xlu1 %v585_v35  ;;  %592 = vmax.xlane.f32.xlu0 %v591_v34  ;;  %v548_v37 = vadd.f32 %v547_v36, %v80_v24 }
 0x248   :  { %v518_v38 = vpop.f32.mrf.mxu2  ;;  %v594_v42 = vsel %vm85_vm0, %v548_v37, -inf }
 0x249   :  { %v519_v39 = vadd.f32 %v518_v38, %v80_v24 }
 0x24a   :  { %v573_v40 = vpop.f32.mrf.mxu1 }
 0x24b   :  { %v588_v41 = vsel %vm85_vm0, %v519_v39, -inf  ;;  %v574_v47 = vadd.f32 %v573_v40, %v79_v17  ;;  %v1901_v40 = vld [vmem:[#allocation2 + $0x170] sm:$0xff] }
 0x24c   :  { %589 = vmax.xlane.f32.xlu2 %v588_v41  ;;  %v1904_v41 = vld [vmem:[#allocation2 + $0x178] sm:$0xff] }
 0x24d   :  { %v597_v48 = vsel %vm85_vm0, %v574_v47, -inf }
 0x24e   :  { %595 = vmax.xlane.f32.xlu1 %v594_v42  ;;  %v1907_v42 = vld [vmem:[#allocation2 + $0x160] sm:$0xff] }
 0x252   :  { %v576_v43 = vpop.f32.mrf.mxu1 }
 0x253   :  { %v577_v44 = vadd.f32 %v576_v43, %v80_v24 }
 0x255   :  { %v600_v45 = vsel %vm85_vm0, %v577_v44, -inf }
 0x256   :  { %601 = vmax.xlane.f32.xlu2 %v600_v45 }
 0x25a   :  { %231 = vperm.xlu0 %1605, %v1878_v46  }
 0x25e   :  { %598 = vmax.xlane.f32.xlu2 %v597_v48 }
 0x2a9   :  { %v581_v49 = vpop.xlane.xlu1 %580 }
 0x2aa   :  { %v603_v50 = vsub.f32 %v487_v20, %v581_v49 }
 0x2ac   :  { %v611_v51 = vmul.f32 1.442695, %v603_v50 }
 0x2ae   :  { %1623 = vpow2.f32 %v611_v51  ;;  %v322_v51 = vpop.f32.mrf.mxu0 }
 0x2b1   :  { %v584_v53 = vpop.xlane.xlu0 %583 }
 0x2b2   :  { %v604_v54 = vsub.f32 %v490_v26, %v584_v53 }
 0x2b4   :  { %v1883_v55 = vpop.eup %1623  ;;  %v613_v56 = vmul.f32 1.442695, %v604_v54 }
 0x2b5   :  { %v627_v58 = vsel %vm85_vm0, %v1883_v55, 0.0 }
 0x2b6   :  { %1625 = vpow2.f32 %v613_v56  ;;  %628 = vadd.xlane.f32.xlu1 %v627_v58 }
 0x2b9   :  { %v587_v59 = vpop.xlane.xlu1 %586  ;;  %v593_v60 = vpop.xlane.xlu0 %592 }
 0x2ba   :  { %v605_v61 = vsub.f32 %v516_v33, %v587_v59  ;;  %v607_v62 = vsub.f32 %v545_v30, %v593_v60  ;;  %v325_v59 = vpop.f32.mrf.mxu0 }
 0x2bc   :  { %v1626_v63 = vpop.eup %1625  ;;  %v615_v0 = vmul.f32 1.442695, %v605_v61  ;;  %v619_v1 = vmul.f32 1.442695, %v607_v62 }
 0x2bd   :  { %v630_v2 = vsel %vm85_vm0, %v1626_v63, 0.0 }
 0x2be   :  { %1627 = vpow2.f32 %v615_v0  ;;  %631 = vadd.xlane.f32.xlu2 %v630_v2 }
 0x2bf   :  { %1629 = vpow2.f32 %v619_v1  ;;  %v590_v3 = vpop.xlane.xlu2 %589 }
 0x2c0   :  { %v606_v10 = vsub.f32 %v519_v39, %v590_v3 }
 0x2c1   :  { %v596_v13 = vpop.xlane.xlu1 %595 }
 0x2c2   :  { %v617_v14 = vmul.f32 1.442695, %v606_v10  ;;  %v608_v15 = vsub.f32 %v548_v37, %v596_v13  ;;  %v328_v3 = vpop.f32.mrf.mxu0 }
 0x2c4   :  { %v1889_v16 = vpop.eup %1627  ;;  %1631 = vpow2.f32 %v617_v14  ;;  %v621_v17 = vmul.f32 1.442695, %v608_v15 }
 0x2c5   :  { %v1891_v19 = vpop.eup %1629  ;;  %v633_v20 = vsel %vm85_vm0, %v1889_v16, 0.0 }
 0x2c6   :  { %1633 = vpow2.f32 %v621_v17  ;;  %634 = vadd.xlane.f32.xlu0 %v633_v20  ;;  %v639_v22 = vsel %vm85_vm0, %v1891_v19, 0.0 }
 0x2c7   :  { %640 = vadd.xlane.f32.xlu2 %v639_v22 }
 0x2c9   :  { %v602_v24 = vpop.xlane.xlu2 %601 }
 0x2ca   :  { %v1632_v25 = vpop.eup %1631  ;;  %v610_v26 = vsub.f32 %v577_v44, %v602_v24  ;;  %v331_v17 = vpop.f32.mrf.mxu0 }
 0x2cb   :  { %v636_v27 = vsel %vm85_vm0, %v1632_v25, 0.0 }
 0x2cc   :  { %v1634_v29 = vpop.eup %1633  ;;  %v625_v30 = vmul.f32 1.442695, %v610_v26  ;;  %637 = vadd.xlane.f32.xlu1 %v636_v27  ;;  %v232_v43 = vpop.permute.xlu0 %231 }
 0x2cd   :  { %v642_v32 = vsel %vm85_vm0, %v1634_v29, 0.0  ;;  %v326_v2 = vadd.f32 %v325_v59, %v232_v43 }
 0x2ce   :  { %1635 = vpow2.f32 %v625_v30  ;;  %643 = vadd.xlane.f32.xlu0 %v642_v32  ;;  %v1758_v30 = vmov 6  }
 0x2d1   :  { %v599_v33 = vpop.xlane.xlu2 %598 }
 0x2d2   :  { %v609_v34 = vsub.f32 %v574_v47, %v599_v33  ;;  %v1759_v33 = vmov 5  }
 0x2d4   :  { %v1636_v35 = vpop.eup %1635  ;;  %v623_v36 = vmul.f32 1.442695, %v609_v34  ;;  %v1760_v34 = vmov 4  }
 0x2d5   :  { %v648_v37 = vsel %vm85_vm0, %v1636_v35, 0.0 }
 0x2d6   :  { %1637 = vpow2.f32 %v623_v36  ;;  %649 = vadd.xlane.f32.xlu2 %v648_v37  ;;  %v59_v36 = vld [vmem:[#allocation2 + $0x100] sm:$0xff]  ;;  %v60_v37 = vld [vmem:[#allocation2 + $0x108] sm:$0xff] }
 0x2dc   :  { %v1638_v38 = vpop.eup %1637 }
 0x2dd   :  { %v645_v39 = vsel %vm85_vm0, %v1638_v38, 0.0 }
 0x2de   :  { %646 = vadd.xlane.f32.xlu1 %v645_v39  ;;  %v62_v39 = vld [vmem:[#allocation2 + $0x118] sm:$0xff] }
 0x2e2   :  { %236 = vperm.xlu0 %1605, %v1901_v40  }
 0x2ea   :  { %1607 = vset.pattern.permute.xlu0 %v1758_v30 }
 0x2eb   :  { %788 = vperm.xlu0 %1607, %v1816_v18  }
 0x2ee   :  { %241 = vperm.xlu2 %1603, %v1904_v41  }
 0x2f3   :  { %1611 = vset.pattern.permute.xlu0 %v1759_v33 }
 0x2f4   :  { %928 = vperm.xlu0 %1611, %v1781_v4  }
 0x2f6   :  { %1608 = vset.pattern.permute.xlu2 %v1758_v30 }
 0x2f7   :  { %226 = vperm.xlu1 %1604, %v1907_v42   ;;  %792 = vperm.xlu2 %1608, %v1785_v5  }
 0x2fc   :  { %916 = vperm.xlu0 %1611, %v1820_v21  }
 0x2ff   :  { %1606 = vset.pattern.permute.xlu1 %v1758_v30  ;;  %1609 = vset.pattern.permute.xlu2 %v1760_v34 }
 0x300   :  { %784 = vperm.xlu1 %1606, %v1820_v21   ;;  %908 = vperm.xlu2 %1609, %v1781_v4  }
 0x308   :  { %796 = vperm.xlu1 %1606, %v1781_v4   ;;  %900 = vperm.xlu2 %1609, %v1816_v18  }
 0x310   :  { %1610 = vset.pattern.permute.xlu1 %v1760_v34  ;;  %896 = vperm.xlu2 %1609, %v1820_v21  }
 0x311   :  { %904 = vperm.xlu1 %1610, %v1785_v5  }
 0x319   :  { %1612 = vset.pattern.permute.xlu1 %v1759_v33  ;;  %v77_v33 = vld [vmem:[#allocation2 + $0x190] sm:$0xff] }
 0x31a   :  { %924 = vperm.xlu1 %1612, %v1785_v5  }
 0x322   :  { %920 = vperm.xlu1 %1612, %v1816_v18  }
 0x329   :  { %v629_v44 = vpop.xlane.xlu1 %628 }
 0x331   :  { %v632_v45 = vpop.xlane.xlu2 %631 }
 0x332   :  { %1639 = vrcp.f32 %v632_v45 }
 0x333   :  { %1641 = vrcp.f32 %v629_v44 }
 0x338   :  { %v1640_v47 = vpop.eup %1639 }
 0x339   :  { %v635_v48 = vpop.xlane.xlu0 %634  ;;  %v660_v49 = vmul.f32 %v1640_v47, %v1626_v63  ;;  %v1642_v50 = vpop.eup %1641 }
 0x33a   :  { %v659_v52 = vmul.f32 %v1642_v50, %v1883_v55  ;;  %v641_v54 = vpop.xlane.xlu2 %640 }
 0x33b   :  { %1530 = vmatpush.xpose.msk.msrb.mxu2 %vm85_vm0, %v660_v49 }
 0x33f   :  { %v638_v53 = vpop.xlane.xlu1 %637  ;;  %1531 = vmatpush.xpose.msk.msrb.mxu2 %vm85_vm0, %v659_v52 }
 0x340   :  { %1643 = vrcp.f32 %v638_v53 }
 0x341   :  { %1645 = vrcp.f32 %v635_v48  ;;  %v644_v56 = vpop.xlane.xlu0 %643 }
 0x342   :  { %1647 = vrcp.f32 %v644_v56 }
 0x343   :  { %1649 = vrcp.f32 %v641_v54 }
 0x346   :  { %v1644_v57 = vpop.eup %1643 }
 0x347   :  { %v1646_v58 = vpop.eup %1645  ;;  %v662_v60 = vmul.f32 %v1644_v57, %v1632_v25 }
 0x348   :  { %v1648_v61 = vpop.eup %1647  ;;  %v661_v55 = vmul.f32 %v1646_v58, %v1889_v16 }
 0x349   :  { %v664_v62 = vmul.f32 %v1648_v61, %v1634_v29  ;;  %1533 = vmatpush.xpose.msk.msrb.mxu3 %vm85_vm0, %v662_v60  ;;  %v650_v63 = vpop.xlane.xlu2 %649  ;;  %v1650_v0 = vpop.eup %1649 }
 0x34a   :  { %1651 = vrcp.f32 %v650_v63  ;;  %v663_v1 = vmul.f32 %v1650_v0, %v1891_v19 }
 0x34b   :  { %1536 = vmatpush.xpose.msk.msra.mxu2 %vm85_vm0, %v664_v62 }
 0x34d   :  { %1534 = vmatpush.xpose.msk.msrb.mxu3 %vm85_vm0, %v661_v55 }
 0x34f   :  { %1537 = vmatpush.xpose.msk.msra.mxu2 %vm85_vm0, %v663_v1 }
 0x350   :  { %v1652_v10 = vpop.eup %1651  ;;  %1535 = vmatmul.msk.f32.vlgmr.msrb.gmra.mxu3 %vm85_vm0, %v326_v2 }
 0x351   :  { %v666_v13 = vmul.f32 %v1652_v10, %v1636_v35  ;;  %v647_v14 = vpop.xlane.xlu1 %646  ;;  %v242_v20 = vpop.permute.xlu2 %241 }
 0x352   :  { %1653 = vrcp.f32 %v647_v14  ;;  %v332_v22 = vadd.f32 %v331_v17, %v242_v20 }
 0x353   :  { %1539 = vmatpush.xpose.msk.msra.mxu3 %vm85_vm0, %v666_v13 }
 0x354   :  { %v237_v25 = vpop.permute.xlu0 %236 }
 0x355   :  { %v329_v26 = vadd.f32 %v328_v3, %v237_v25 }
 0x358   :  { %v1654_v15 = vpop.eup %1653 }
 0x359   :  { %v665_v16 = vmul.f32 %v1654_v15, %v1638_v38  ;;  %v61_v38 = vld [vmem:[#allocation2 + $0x110] sm:$0xff]  ;;  %v793_v48 = vpop.permute.xlu2 %792 }
 0x35b   :  { %1540 = vmatpush.xpose.msk.msra.mxu3 %vm85_vm0, %v665_v16 }
 0x35d   :  { %v789_v45 = vpop.permute.xlu0 %788 }
 0x35e   :  { %1541 = vmatmul.msk.f32.vlgmr.msra.gmra.mxu3 %vm85_vm0, %v332_v22 }
 0x369   :  { %v227_v19 = vpop.permute.xlu1 %226 }
 0x36a   :  { %v323_v24 = vadd.f32 %v322_v51, %v227_v19 }
 0x36c   :  { %1532 = vmatmul.msk.f32.vlgmr.msrb.gmra.mxu2 %vm85_vm0, %v323_v24 }
 0x372   :  { %v785_v47 = vpop.permute.xlu1 %784 }
 0x374   :  { %1538 = vmatmul.msk.f32.vlgmr.msra.gmra.mxu2 %vm85_vm0, %v329_v26 }
 0x37a   :  { %v797_v58 = vpop.permute.xlu1 %796 }
 0x3d3   :  { %v722_v27 = vpop.f32.mrf.mxu3 }
 0x3e1   :  { %v780_v29 = vpop.f32.mrf.mxu3 }
 0x3e2   :  { %823 = vmatpush.msrb.mxu3 %v780_v29 }
 0x3ef   :  { %v693_v32 = vpop.f32.mrf.mxu2 }
 0x3f7   :  { %v751_v35 = vpop.f32.mrf.mxu2 }
 0x3f8   :  { %824 = vmatpush.msrb.mxu3 %v751_v35 }
 0x3fa   :  { %825 = vmatpush.msrb.mxu3 %v722_v27 }
 0x3fc   :  { %826 = vmatpush.msrb.mxu3 %v693_v32  ;;  %v1761_v32 = vmov 0  }
 0x3fd   :  { %1542 = vmatmul.msk.f32.vlgmr.msrb.gmra.mxu3 %vm244_vm5, %v59_v36  ;;  %1614 = vset.pattern.permute.xlu1 %v1761_v32 }
 0x3fe   :  { %1615 = vset.pattern.permute.xlu0 %v1761_v32  ;;  %995 = vperm.xlu1 %1614, %v77_v33  }
 0x3ff   :  { %1613 = vset.pattern.permute.xlu2 %v1761_v32 }
 0x405   :  { %1543 = vmatmul.msk.f32.gmra.mxu3 %vm244_vm5, %v60_v37 }
 0x406   :  { %980 = vperm.xlu1 %1614, %v1904_v41  }
 0x40d   :  { %1544 = vmatmul.msk.f32.gmra.mxu3 %vm244_vm5, %v61_v38 }
 0x40e   :  { %972 = vperm.xlu1 %1614, %v1878_v46  }
 0x415   :  { %1545 = vmatmul.msk.f32.gmra.mxu3 %vm244_vm5, %v62_v39 }
 0x416   :  { %960 = vperm.xlu1 %1614, %v1843_v12  }
 0x41e   :  { %948 = vperm.xlu1 %1614, %v1781_v4  }
 0x426   :  { %936 = vperm.xlu1 %1614, %v1820_v21   ;;  %v31_v21 = vld [vmem:[#allocation2 + $0x20] sm:$0xff] }
 0x480   :  { %v828_v43 = vpop.f32.mrf.mxu3 }
 0x481   :  { %v829_v51 = vadd.f32 %v828_v43, %v785_v47 }
 0x483   :  { %v1945_v54 = vadd.f32 %v829_v51, %v1790_v6 }
 0x485   :  { %2541 = vst [vmem:[#allocation6_spill] sm:$0xff] %v1945_v54  ;;  %v844_v60 = vsel %vm85_vm0, %v1945_v54, 0.0 }
 0x488   :  { %v831_v44 = vpop.f32.mrf.mxu3 }
 0x489   :  { %v832_v49 = vadd.f32 %v831_v44, %v789_v45 }
 0x48b   :  { %v1942_v53 = vadd.f32 %v832_v49, %v1795_v7  ;;  %v905_v49 = vpop.permute.xlu1 %904 }
 0x48d   :  { %2540 = vst [vmem:[#allocation5_spill] sm:$0xff] %v1942_v53  ;;  %v845_v57 = vsel %vm85_vm0, %v1942_v53, 0.0 }
 0x48e   :  { %v846_v7 = vadd.f32 %v845_v57, %v844_v60  ;;  %v78_v57 = vld [vmem:[#allocation2 + $0x198] sm:$0xff] }
 0x48f   :  { %1000 = vperm.xlu2 %1613, %v78_v57  }
 0x490   :  { %v834_v50 = vpop.f32.mrf.mxu3 }
 0x491   :  { %v835_v52 = vadd.f32 %v834_v50, %v793_v48  ;;  %v909_v48 = vpop.permute.xlu2 %908 }
 0x493   :  { %v1948_v56 = vadd.f32 %v835_v52, %v1801_v8  ;;  %v76_v52 = vld [vmem:[#allocation2 + $0x188] sm:$0xff]  ;;  %v925_v46 = vpop.permute.xlu1 %924 }
 0x494   :  { %990 = vperm.xlu0 %1615, %v76_v52  }
 0x495   :  { %2542 = vst [vmem:[#allocation7_spill] sm:$0xff] %v1948_v56  ;;  %v847_v61 = vsel %vm85_vm0, %v1948_v56, 0.0 }
 0x496   :  { %v848_v6 = vadd.f32 %v847_v61, %v846_v7  ;;  %v75_v61 = vld [vmem:[#allocation2 + $0x180] sm:$0xff] }
 0x497   :  { %985 = vperm.xlu2 %1613, %v75_v61  }
 0x498   :  { %v837_v59 = vpop.f32.mrf.mxu3 }
 0x499   :  { %v838_v62 = vadd.f32 %v837_v59, %v797_v58  ;;  %v901_v60 = vpop.permute.xlu2 %900 }
 0x49b   :  { %v1957_v63 = vadd.f32 %v838_v62, %v1806_v9  ;;  %v929_v62 = vpop.permute.xlu0 %928 }
 0x49c   :  { %968 = vperm.xlu0 %1615, %v1907_v42  }
 0x49d   :  { %2543 = vst [vmem:[#allocation8_spill] sm:$0xff] %v1957_v63  ;;  %v849_v8 = vsel %vm85_vm0, %v1957_v63, 0.0 }
 0x49e   :  { %v850_v0 = vadd.f32 %v849_v8, %v848_v6 }
 0x49f   :  { %976 = vperm.xlu2 %1613, %v1901_v40   ;;  %v39_v40 = vld [vmem:[#allocation2 + $0x60] sm:$0xff] }
 0x4a0   :  { %v851_v55 = vrot.slane %v850_v0, 4 }
 0x4a2   :  { %v852_v1 = vadd.f32 %v851_v55, %v850_v0 }
 0x4a4   :  { %v853_v2 = vrot.slane %v852_v1, 2  ;;  %956 = vperm.xlu0 %1615, %v1847_v23   ;;  %v32_v23 = vld [vmem:[#allocation2 + $0x28] sm:$0xff] }
 0x4a6   :  { %v854_v3 = vadd.f32 %v853_v2, %v852_v1 }
 0x4a7   :  { %964 = vperm.xlu2 %1613, %v1851_v31   ;;  %v35_v31 = vld [vmem:[#allocation2 + $0x40] sm:$0xff] }
 0x4a8   :  { %v855_v10 = vrot.slane %v854_v3, 1 }
 0x4aa   :  { %v856_v13 = vadd.f32 %v855_v10, %v854_v3  ;;  %v897_v3 = vpop.permute.xlu2 %896 }
 0x4ac   :  { %v857_v14 = vmul.f32 %v856_v13, %v1824_v28  ;;  %944 = vperm.xlu0 %1615, %v1785_v5   ;;  %v41_v5 = vld [vmem:[#allocation2 + $0x70] sm:$0xff] }
 0x4ae   :  { %v860_v15 = vsub.f32 %v1948_v56, %v857_v14  ;;  %v858_v17 = vsub.f32 %v1945_v54, %v857_v14  ;;  %v859_v9 = vsub.f32 %v1942_v53, %v857_v14  ;;  %v861_v20 = vsub.f32 %v1957_v63, %v857_v14  ;;  %v921_v14 = vpop.permute.xlu1 %920 }
 0x4af   :  { %952 = vperm.xlu2 %1613, %v1841_v11   ;;  %v36_v11 = vld [vmem:[#allocation2 + $0x48] sm:$0xff] }
 0x4b0   :  { %v862_v16 = vmul.f32 %v858_v17, %v858_v17  ;;  %v863_v22 = vmul.f32 %v859_v9, %v859_v9  ;;  %v864_v19 = vmul.f32 %v860_v15, %v860_v15  ;;  %v865_v24 = vmul.f32 %v861_v20, %v861_v20 }
 0x4b2   :  { %v866_v25 = vsel %vm85_vm0, %v862_v16, 0.0  ;;  %v867_v26 = vsel %vm85_vm0, %v863_v22, 0.0  ;;  %v869_v29 = vsel %vm85_vm0, %v864_v19, 0.0  ;;  %v871_v34 = vsel %vm85_vm0, %v865_v24, 0.0  ;;  %v40_v16 = vld [vmem:[#allocation2 + $0x68] sm:$0xff]  ;;  %v34_v22 = vld [vmem:[#allocation2 + $0x38] sm:$0xff] }
 0x4b3   :  { %v868_v27 = vadd.f32 %v867_v26, %v866_v25  ;;  %v42_v19 = vld [vmem:[#allocation2 + $0x78] sm:$0xff]  ;;  %v43_v24 = vld [vmem:[#allocation2 + $0x80] sm:$0xff]  ;;  %v37_v25 = vld [vmem:[#allocation2 + $0x50] sm:$0xff] }
 0x4b4   :  { %v45_v26 = vld [vmem:[#allocation2 + $0x90] sm:$0xff] }
 0x4b5   :  { %v870_v30 = vadd.f32 %v869_v29, %v868_v27  ;;  %v46_v27 = vld [vmem:[#allocation2 + $0x98] sm:$0xff] }
 0x4b6   :  { %v1999_v29 = vpop.permute.xlu1 %995 }
 0x4b7   :  { %v872_v35 = vadd.f32 %v871_v34, %v870_v30  ;;  %940 = vperm.xlu2 %1613, %v1816_v18   ;;  %v44_v18 = vld [vmem:[#allocation2 + $0x88] sm:$0xff] }
 0x4b9   :  { %v873_v36 = vrot.slane %v872_v35, 4 }
 0x4bb   :  { %v874_v37 = vadd.f32 %v873_v36, %v872_v35 }
 0x4bd   :  { %v875_v38 = vrot.slane %v874_v37, 2 }
 0x4be   :  { %v981_v32 = vpop.permute.xlu1 %980 }
 0x4bf   :  { %v876_v39 = vadd.f32 %v875_v38, %v874_v37 }
 0x4c1   :  { %v877_v43 = vrot.slane %v876_v39, 1 }
 0x4c3   :  { %v878_v44 = vadd.f32 %v877_v43, %v876_v39 }
 0x4c5   :  { %v879_v45 = vmul.f32 %v878_v44, %v1824_v28 }
 0x4c6   :  { %v973_v36 = vpop.permute.xlu1 %972 }
 0x4c7   :  { %v880_v47 = vadd.f32 1e-05, %v879_v45 }
 0x4c9   :  { %1655 = vrsqrt.f32 %v880_v47  ;;  %vm887_vm8 = vweird.f32 %v880_v47 }
 0x4ce   :  { %v2003_v44 = vpop.permute.xlu1 %960 }
 0x4cf   :  { %v1656_v50 = vpop.eup %1655 }
 0x4d0   :  { %v882_v51 = vmul.f32 %v1656_v50, %v880_v47  ;;  %vm888_vm7 = vweird.f32 %v1656_v50 }
 0x4d1   :  { %vm889_vm9 = vmor %vm887_vm8, %vm888_vm7 }
 0x4d2   :  { %v883_v41 = vmul.f32 %v1656_v50, %v882_v51 }
 0x4d4   :  { %v884_v58 = vmul.f32 0.5, %v883_v41 }
 0x4d6   :  { %v885_v59 = vsub.f32 1.5, %v884_v58 }
 0x4d8   :  { %v886_v28 = vmul.f32 %v1656_v50, %v885_v59 }
 0x4da   :  { %v890_v12 = vsel %vm889_vm9, %v1656_v50, %v886_v28  ;;  %v949_v50 = vpop.permute.xlu1 %948 }
 0x4db   :  { %v894_v7 = vmul.f32 %v890_v12, %v861_v20  ;;  %v893_v6 = vmul.f32 %v890_v12, %v860_v15  ;;  %v892_v8 = vmul.f32 %v890_v12, %v859_v9  ;;  %v891_v1 = vmul.f32 %v890_v12, %v858_v17  ;;  %v917_v15 = vpop.permute.xlu0 %916  ;;  %v38_v17 = vld [vmem:[#allocation2 + $0x58] sm:$0xff]  ;;  %v33_v20 = vld [vmem:[#allocation2 + $0x30] sm:$0xff] }
 0x4dd   :  { %v914_v0 = vmul.f32 %v909_v48, %v894_v7  ;;  %v913_v55 = vmul.f32 %v905_v49, %v893_v6  ;;  %v912_v2 = vmul.f32 %v901_v60, %v892_v8  ;;  %v911_v13 = vmul.f32 %v897_v3, %v891_v1 }
 0x4df   :  { %v934_v4 = vadd.f32 %v929_v62, %v914_v0  ;;  %v933_v10 = vadd.f32 %v925_v46, %v913_v55  ;;  %v932_v42 = vadd.f32 %v921_v14, %v912_v2  ;;  %v931_v9 = vadd.f32 %v917_v15, %v911_v13 }
 0x4e1   :  { %1063 = vmatpush.msrb.mxu1 %v934_v4  ;;  %1579 = vmatpush.msrb.mxu2 %v934_v4 }
 0x4e2   :  { %v937_v60 = vpop.permute.xlu1 %936 }
 0x4e3   :  { %1064 = vmatpush.msrb.mxu1 %v933_v10  ;;  %1580 = vmatpush.msrb.mxu2 %v933_v10 }
 0x4e5   :  { %1065 = vmatpush.msrb.mxu1 %v932_v42  ;;  %1581 = vmatpush.msrb.mxu2 %v932_v42 }
 0x4e7   :  { %1066 = vmatpush.msrb.mxu1 %v931_v9  ;;  %1582 = vmatpush.msrb.mxu2 %v931_v9 }
 0x4e8   :  { %1546 = vmatmul.msk.f32.vlgmr.msrb.gmra.mxu1 %vm244_vm5, %v31_v21  ;;  %1553 = vmatmul.msk.f32.vlgmr.msrb.gmra.mxu2 %vm244_vm5, %v38_v17 }
 0x4e9   :  { %v2001_v30 = vpop.permute.xlu2 %1000 }
 0x4f0   :  { %1547 = vmatmul.msk.f32.gmra.mxu1 %vm244_vm5, %v32_v23  ;;  %1554 = vmatmul.msk.f32.gmra.mxu2 %vm244_vm5, %v39_v40 }
 0x4f1   :  { %v986_v33 = vpop.permute.xlu2 %985 }
 0x4f8   :  { %1548 = vmatmul.msk.f32.gmra.mxu1 %vm244_vm5, %v33_v20  ;;  %1555 = vmatmul.msk.f32.gmra.mxu2 %vm244_vm5, %v40_v16 }
 0x4f9   :  { %v977_v37 = vpop.permute.xlu2 %976 }
 0x500   :  { %1549 = vmatmul.msk.f32.gmra.mxu1 %vm244_vm5, %v34_v22  ;;  %1556 = vmatmul.msk.f32.gmra.mxu2 %vm244_vm5, %v41_v5 }
 0x501   :  { %v965_v45 = vpop.permute.xlu2 %964 }
 0x506   :  { %v991_v39 = vpop.permute.xlu0 %990 }
 0x508   :  { %1550 = vmatmul.msk.f32.gmra.mxu1 %vm244_vm5, %v35_v31  ;;  %1557 = vmatmul.msk.f32.gmra.mxu2 %vm244_vm5, %v42_v19 }
 0x509   :  { %v953_v52 = vpop.permute.xlu2 %952 }
 0x50e   :  { %v969_v49 = vpop.permute.xlu0 %968 }
 0x510   :  { %1551 = vmatmul.msk.f32.gmra.mxu1 %vm244_vm5, %v36_v11  ;;  %1558 = vmatmul.msk.f32.gmra.mxu2 %vm244_vm5, %v43_v24 }
 0x511   :  { %v941_v46 = vpop.permute.xlu2 %940 }
 0x516   :  { %v2005_v41 = vpop.permute.xlu0 %956 }
 0x518   :  { %1552 = vmatmul.msk.f32.gmra.mxu1 %vm244_vm5, %v37_v25  ;;  %1559 = vmatmul.msk.f32.gmra.mxu2 %vm244_vm5, %v44_v18 }
 0x51e   :  { %v945_v8 = vpop.permute.xlu0 %944 }
 0x520   :  { %1560 = vmatmul.msk.f32.gmra.mxu2 %vm244_vm5, %v45_v26 }
 0x528   :  { %1561 = vmatmul.msk.f32.gmra.mxu2 %vm244_vm5, %v46_v27 }
 0x565   :  { %v1068_v34 = vpop.f32.mrf.mxu1 }
 0x566   :  { %v2012_v12 = vadd.f32 %v1068_v34, %v937_v60 }
 0x568   :  { %2545 = vst [vmem:[#allocation10_spill] sm:$0xff] %v2012_v12  ;;  %v1562_v2 = vmul.f32 -1.702, %v2012_v12 }
 0x56a   :  { %v1148_v14 = vmul.f32 1.442695, %v1562_v2 }
 0x56b   :  { %v1089_v35 = vpop.f32.mrf.mxu2 }
 0x56c   :  { %v2007_v59 = vadd.f32 %v1089_v35, %v965_v45 }
 0x56d   :  { %v1071_v38 = vpop.f32.mrf.mxu1 }
 0x56e   :  { %2544 = vst [vmem:[#allocation9_spill] sm:$0xff] %v2007_v59  ;;  %v1569_v61 = vmul.f32 -1.702, %v2007_v59  ;;  %v2015_v6 = vadd.f32 %v1071_v38, %v941_v46 }
 0x570   :  { %2546 = vst [vmem:[#allocation11_spill] sm:$0xff] %v2015_v6  ;;  %v1162_v1 = vmul.f32 1.442695, %v1569_v61  ;;  %v1563_v10 = vmul.f32 -1.702, %v2015_v6 }
 0x572   :  { %1657 = vpow2.f32 %v1162_v1  ;;  %v1150_v9 = vmul.f32 1.442695, %v1563_v10 }
 0x573   :  { %v1092_v43 = vpop.f32.mrf.mxu2 }
 0x574   :  { %v2009_v28 = vadd.f32 %v1092_v43, %v969_v49 }
 0x575   :  { %v1074_v48 = vpop.f32.mrf.mxu1 }
 0x576   :  { %v1570_v7 = vmul.f32 -1.702, %v2009_v28  ;;  %v2020_v4 = vadd.f32 %v1074_v48, %v945_v8 }
 0x578   :  { %2547 = vst [vmem:[#allocation12_spill] sm:$0xff] %v2020_v4  ;;  %v1164_v3 = vmul.f32 1.442695, %v1570_v7  ;;  %v1564_v42 = vmul.f32 -1.702, %v2020_v4  ;;  %v1658_v5 = vpop.eup %1657 }
 0x579   :  { %v2036_v18 = vadd.f32 1.0, %v1658_v5 }
 0x57a   :  { %1659 = vpow2.f32 %v1164_v3  ;;  %v1152_v20 = vmul.f32 1.442695, %v1564_v42 }
 0x57b   :  { %v1095_v47 = vpop.f32.mrf.mxu2  ;;  %1661 = vpow2.f32 %v1148_v14  ;;  %vm1306_vm10 = vweird.f32 %v2036_v18 }
 0x57c   :  { %v2017_v0 = vadd.f32 %v1095_v47, %v973_v36  ;;  %1663 = vpow2.f32 %v1150_v9 }
 0x57d   :  { %v1077_v57 = vpop.f32.mrf.mxu1 }
 0x57e   :  { %v1571_v13 = vmul.f32 -1.702, %v2017_v0  ;;  %v2033_v11 = vadd.f32 %v1077_v57, %v949_v50 }
 0x580   :  { %v1166_v21 = vmul.f32 1.442695, %v1571_v13  ;;  %v1660_v31 = vpop.eup %1659  ;;  %2548 = vst [vmem:[#allocation13_spill] sm:$0xff] %v2033_v11  ;;  %v1565_v38 = vmul.f32 -1.702, %v2033_v11 }
 0x581   :  { %v1662_v26 = vpop.eup %1661  ;;  %v2038_v27 = vadd.f32 1.0, %v1660_v31 }
 0x582   :  { %1665 = vpow2.f32 %v1166_v21  ;;  %v2046_v47 = vadd.f32 1.0, %v1662_v26  ;;  %v1154_v57 = vmul.f32 1.442695, %v1565_v38  ;;  %v1310_v26 = vand.u32 2147483647, %v2036_v18 }
 0x583   :  { %v1098_v51 = vpop.f32.mrf.mxu2  ;;  %1667 = vpow2.f32 %v1152_v20  ;;  %vm1321_vm13 = vweird.f32 %v2038_v27 }
 0x584   :  { %v2025_v15 = vadd.f32 %v1098_v51, %v977_v37  ;;  %vm2119_vm11 = vcmp.eq.f32.partialorder %v1310_v26, 8.507059e+37 }
 0x585   :  { %v1080_v62 = vpop.f32.mrf.mxu1 }
 0x586   :  { %v1572_v16 = vmul.f32 -1.702, %v2025_v15 }
 0x588   :  { %v1168_v24 = vmul.f32 1.442695, %v1572_v16 }
 0x58a   :  { %1669 = vpow2.f32 %v1168_v24 }
 0x58b   :  { %v1101_v58 = vpop.f32.mrf.mxu2  ;;  %1671 = vrcp.f32 %v2036_v18 }
 0x58c   :  { %v2027_v23 = vadd.f32 %v1101_v58, %v981_v32  ;;  %v2040_v32 = vadd.f32 %v1080_v62, %v953_v52  ;;  %1673 = vrcp.f32 %v2038_v27 }
 0x58d   :  { %v1083_v17 = vpop.f32.mrf.mxu1 }
 0x58e   :  { %v1573_v19 = vmul.f32 -1.702, %v2027_v23  ;;  %2549 = vst [vmem:[#allocation14_spill] sm:$0xff] %v2040_v32  ;;  %v1566_v50 = vmul.f32 -1.702, %v2040_v32 }
 0x590   :  { %v1170_v34 = vmul.f32 1.442695, %v1573_v19  ;;  %v1156_v61 = vmul.f32 1.442695, %v1566_v50 }
 0x592   :  { %1675 = vpow2.f32 %v1170_v34 }
 0x593   :  { %v1104_v55 = vpop.f32.mrf.mxu2 }
 0x594   :  { %v2030_v22 = vadd.f32 %v1104_v55, %v986_v33  ;;  %v1664_v33 = vpop.eup %1663 }
 0x595   :  { %v1666_v37 = vpop.eup %1665  ;;  %v1086_v45 = vpop.f32.mrf.mxu1  ;;  %v2049_v49 = vadd.f32 1.0, %v1664_v33 }
 0x596   :  { %v1574_v25 = vmul.f32 -1.702, %v2030_v22  ;;  %v1668_v48 = vpop.eup %1667  ;;  %v2055_v51 = vadd.f32 %v1086_v45, %v2003_v44  ;;  %v2069_v44 = vadd.f32 %v1083_v17, %v2005_v41  ;;  %v1312_v45 = vand.u32 2147483648, %v2036_v18 }
 0x597   :  { %v2062_v60 = vadd.f32 1.0, %v1668_v48  ;;  %v1670_v46 = vpop.eup %1669 }
 0x598   :  { %v1172_v43 = vmul.f32 1.442695, %v1574_v25  ;;  %2550 = vst [vmem:[#allocation15_spill] sm:$0xff] %v2055_v51  ;;  %v2065_v62 = vpop.eup %1671  ;;  %v1568_v7 = vmul.f32 -1.702, %v2055_v51  ;;  %v2076_v2 = vadd.f32 1.0, %v1670_v46 }
 0x599   :  { %2551 = vst [vmem:[#allocation16_spill] sm:$0xff] %v2069_v44  ;;  %v1302_v13 = vmul.f32 %v2065_v62, %v2036_v18  ;;  %v1567_v14 = vmul.f32 -1.702, %v2069_v44  ;;  %vm1307_vm12 = vweird.f32 %v2065_v62 }
 0x59a   :  { %1677 = vpow2.f32 %v1172_v43  ;;  %v1160_v42 = vmul.f32 1.442695, %v1568_v7  ;;  %v1325_v7 = vand.u32 2147483647, %v2038_v27  ;;  %vm2154_vm1 = vmor %vm1306_vm10, %vm1307_vm12 }
 0x59b   :  { %v1107_v40 = vpop.f32.mrf.mxu2  ;;  %1679 = vrcp.f32 %v2046_v47  ;;  %v1303_v19 = vsub.f32 1.0, %v1302_v13 }
 0x59c   :  { %v2042_v35 = vadd.f32 %v1107_v40, %v991_v39  ;;  %v2052_v39 = vadd.f32 1.0, %v1666_v37  ;;  %1681 = vrcp.f32 %v2049_v49  ;;  %vm2143_vm14 = vcmp.eq.f32.partialorder %v1325_v7, 8.507059e+37 }
 0x59d   :  { %v1304_v50 = vmul.f32 %v2065_v62, %v1303_v19 }
 0x59e   :  { %v1575_v52 = vmul.f32 -1.702, %v2042_v35  ;;  %1683 = vrcp.f32 %v2052_v39  ;;  %v1342_v18 = vand.u32 2147483648, %v2052_v39  ;;  %vm1336_vm4 = vweird.f32 %v2052_v39 }
 0x59f   :  { %1685 = vpow2.f32 %v1154_v57  ;;  %v1305_v19 = vadd.f32 %v2065_v62, %v1304_v50  ;;  %v1340_v56 = vand.u32 2147483647, %v2052_v39 }
 0x5a0   :  { %v1174_v8 = vmul.f32 1.442695, %v1575_v52  ;;  %1687 = vrcp.f32 %v2062_v60 }
 0x5a1   :  { %1689 = vpow2.f32 %v1156_v61 }
 0x5a2   :  { %1691 = vpow2.f32 %v1174_v8 }
 0x5a3   :  { %v1110_v36 = vpop.f32.mrf.mxu2  ;;  %1693 = vrcp.f32 %v2076_v2 }
 0x5a4   :  { %v2059_v58 = vadd.f32 %v1110_v36, %v1999_v29  ;;  %v2072_v29 = vpop.eup %1673 }
 0x5a5   :  { %v1676_v1 = vpop.eup %1675  ;;  %v1317_v21 = vmul.f32 %v2072_v29, %v2038_v27  ;;  %vm1322_vm15 = vweird.f32 %v2072_v29 }
 0x5a6   :  { %v1576_v55 = vmul.f32 -1.702, %v2059_v58  ;;  %v1678_v10 = vpop.eup %1677  ;;  %v2087_v17 = vadd.f32 1.0, %v1676_v1  ;;  %vm2175_vm2 = vmor %vm1321_vm13, %vm1322_vm15 }
 0x5a7   :  { %v2080_v41 = vpop.eup %1679  ;;  %v2095_v5 = vadd.f32 1.0, %v1678_v10  ;;  %v1318_v36 = vsub.f32 1.0, %v1317_v21 }
 0x5a8   :  { %v2083_v9 = vpop.eup %1681  ;;  %v1176_v40 = vmul.f32 1.442695, %v1576_v55  ;;  %v1197_v33 = vmul.f32 %v2080_v41, %v2046_v47  ;;  %vm1366_vm10 = vweird.f32 %v2087_v17 }
 0x5a9   :  { %v2092_v16 = vpop.eup %1683  ;;  %v1212_v48 = vmul.f32 %v2083_v9, %v2049_v49  ;;  %v1319_v1 = vmul.f32 %v2072_v29, %v1318_v36  ;;  %vm1381_vm7 = vweird.f32 %v2095_v5 }
 0x5aa   :  { %v1686_v31 = vpop.eup %1685  ;;  %1695 = vpow2.f32 %v1176_v40  ;;  %v1332_v37 = vmul.f32 %v2092_v16, %v2052_v39  ;;  %v1198_v61 = vsub.f32 1.0, %v1197_v33  ;;  %vm1337_vm3 = vweird.f32 %v2092_v16 }
 0x5ab   :  { %v1113_v3 = vpop.f32.mrf.mxu2  ;;  %v2098_v25 = vpop.eup %1687  ;;  %1697 = vpow2.f32 %v1160_v42  ;;  %v2111_v52 = vadd.f32 1.0, %v1686_v31  ;;  %v1327_v42 = vand.u32 2147483648, %v2038_v27  ;;  %v1213_v21 = vsub.f32 1.0, %v1212_v48  ;;  %vm2216_vm5 = vmor %vm1336_vm4, %vm1337_vm3 }
 0x5ac   :  { %v2090_v20 = vadd.f32 %v1113_v3, %v2001_v30  ;;  %v1158_v30 = vmul.f32 1.442695, %v1567_v14  ;;  %v1690_v34 = vpop.eup %1689  ;;  %1699 = vrcp.f32 %v2087_v17  ;;  %v1333_v3 = vsub.f32 1.0, %v1332_v37 }
 0x5ad   :  { %v1692_v43 = vpop.eup %1691  ;;  %1701 = vrcp.f32 %v2095_v5  ;;  %v2124_v10 = vadd.f32 1.0, %v1690_v34  ;;  %v1313_v14 = vor.u32 1.1754944e-38, %v1312_v45  ;;  %v2140_v33 = vmul.f32 %v2080_v41, %v1198_v61 }
 0x5ae   :  { %v1577_v24 = vmul.f32 -1.702, %v2090_v20  ;;  %v2113_v57 = vadd.f32 1.0, %v1692_v43  ;;  %v2115_v46 = vpop.eup %1693  ;;  %v1320_v36 = vadd.f32 %v2072_v29, %v1319_v1  ;;  %v1334_v37 = vmul.f32 %v2092_v16, %v1333_v3 }
 0x5af   :  { %2554 = vst [vmem:[#allocation17_spill] sm:$0xff] %v2140_v33  ;;  %v1328_v45 = vor.u32 1.1754944e-38, %v1327_v42  ;;  %v2159_v48 = vmul.f32 %v2083_v9, %v1213_v21  ;;  %v1347_v50 = vmul.f32 %v2115_v46, %v2076_v2  ;;  %vm1352_vm9 = vweird.f32 %v2115_v46 }
 0x5b0   :  { %v1178_v38 = vmul.f32 1.442695, %v1577_v24  ;;  %v1696_v8 = vpop.eup %1695  ;;  %v1227_v24 = vmul.f32 %v2098_v25, %v2062_v60  ;;  %v1324_v27 = vsel %vm2175_vm2, %v2072_v29, %v1320_v36  ;;  %v2207_v29 = vor.u32 1.1754944e-38, %v1342_v18 }
 0x5b1   :  { %v1698_v13 = vpop.eup %1697  ;;  %v2128_v40 = vadd.f32 1.0, %v1696_v8  ;;  %2559 = vst [vmem:[#allocation18_spill] sm:$0xff] %v2159_v48  ;;  %v1309_v8 = vsel %vm2154_vm1, %v2065_v62, %v1305_v19  ;;  %v1348_v53 = vsub.f32 1.0, %v1347_v50  ;;  %v2214_v55 = vsel %vm2143_vm14, %v1328_v45, %v1324_v27 }
 0x5b2   :  { %1703 = vpow2.f32 %v1178_v38  ;;  %v2130_v31 = vpop.eup %1699  ;;  %v1228_v1 = vsub.f32 1.0, %v1227_v24  ;;  %v2171_v3 = vadd.f32 1.0, %v1698_v13  ;;  %v2192_v13 = vadd.f32 %v2092_v16, %v1334_v37  ;;  %2563 = vst [vmem:[#allocation20_spill] sm:$0xff] %v2214_v55 }
 0x5b3   :  { %1705 = vpow2.f32 %v1158_v30  ;;  %v2137_v26 = vpop.eup %1701  ;;  %v1362_v21 = vmul.f32 %v2130_v31, %v2087_v17  ;;  %v2201_v63 = vsel %vm2119_vm11, %v1313_v14, %v1309_v8  ;;  %vm1367_vm6 = vweird.f32 %v2130_v31 }
 0x5b4   :  { %1707 = vrcp.f32 %v2113_v57  ;;  %2562 = vst [vmem:[#allocation19_spill] sm:$0xff] %v2201_v63  ;;  %v2221_v39 = vmul.f32 %v2098_v25, %v1228_v1  ;;  %v1385_v27 = vand.u32 2147483647, %v2095_v5  ;;  %vm1382_vm8 = vweird.f32 %v2137_v26 }
 0x5b5   :  { %1709 = vrcp.f32 %v2111_v52  ;;  %vm1411_vm11 = vweird.f32 %v2128_v40  ;;  %vm1351_vm14 = vweird.f32 %v2076_v2  ;;  %vm1396_vm1 = vweird.f32 %v2113_v57 }
 0x5b6   :  { %1711 = vrcp.f32 %v2128_v40  ;;  %2566 = vst [vmem:[#allocation21_spill] sm:$0xff] %v2221_v39  ;;  %v1402_v33 = vand.u32 2147483648, %v2113_v57  ;;  %vm2278_vm3 = vcmp.eq.f32.partialorder %v1340_v56, 8.507059e+37  ;;  %v1295_v14 = vand.u32 2147483647, %v2171_v3 }
 0x5b7   :  { %1713 = vrcp.f32 %v2124_v10 }
 0x5b8   :  { %v1704_v34 = vpop.eup %1703 }
 0x5b9   :  { %v1706_v38 = vpop.eup %1705  ;;  %v2163_v61 = vadd.f32 1.0, %v1704_v34  ;;  %v1377_v34 = vmul.f32 %v2137_v26, %v2095_v5 }
 0x5ba   :  { %v2165_v7 = vpop.eup %1707  ;;  %v2195_v24 = vadd.f32 1.0, %v1706_v38  ;;  %v1363_v38 = vsub.f32 1.0, %v1362_v21  ;;  %v1387_v21 = vand.u32 2147483648, %v2095_v5 }
 0x5bb   :  { %v1392_v62 = vmul.f32 %v2165_v7, %v2113_v57  ;;  %1715 = vrcp.f32 %v2163_v61  ;;  %v2186_v19 = vpop.eup %1709  ;;  %v1378_v50 = vsub.f32 1.0, %v1377_v34  ;;  %vm1397_vm13 = vweird.f32 %v2165_v7 }
 0x5bc   :  { %v2197_v43 = vpop.eup %1711  ;;  %1717 = vrcp.f32 %v2171_v3  ;;  %v2229_v18 = vmul.f32 %v2186_v19, %v2111_v52  ;;  %v1364_v54 = vmul.f32 %v2130_v31, %v1363_v38  ;;  %v1415_v38 = vand.u32 2147483647, %v2128_v40  ;;  %vm2284_vm4 = vmor %vm1396_vm1, %vm1397_vm13 }
 0x5bd   :  { %v2205_v42 = vpop.eup %1713  ;;  %v1393_v36 = vsub.f32 1.0, %v1392_v62  ;;  %v1407_v37 = vmul.f32 %v2197_v43, %v2128_v40  ;;  %1719 = vrcp.f32 %v2195_v24  ;;  %v1349_v62 = vmul.f32 %v2115_v46, %v1348_v53 }
 0x5be   :  { %v2235_v1 = vmul.f32 %v2205_v42, %v2124_v10  ;;  %v1379_v12 = vmul.f32 %v2137_v26, %v1378_v50  ;;  %vm1412_vm12 = vweird.f32 %v2197_v43  ;;  %v1417_v50 = vand.u32 2147483648, %v2128_v40 }
 0x5bf   :  { %v1408_v30 = vsub.f32 1.0, %v1407_v37  ;;  %v1394_v8 = vmul.f32 %v2165_v7, %v1393_v36  ;;  %v1432_v6 = vand.u32 2147483648, %v2163_v61  ;;  %v1430_v32 = vand.u32 2147483647, %v2163_v61  ;;  %vm2274_vm2 = vmor %vm1411_vm11, %vm1412_vm12 }
 0x5c0   :  { %vm1426_vm11 = vweird.f32 %v2163_v61  ;;  %v1365_v56 = vadd.f32 %v2130_v31, %v1364_v54  ;;  %v1418_v63 = vor.u32 1.1754944e-38, %v1417_v50  ;;  %vm1416_vm13 = vcmp.eq.f32.partialorder %v1415_v38, 8.507059e+37 }
 0x5c1   :  { %v1716_v45 = vpop.eup %1715  ;;  %v1409_v37 = vmul.f32 %v2197_v43, %v1408_v30  ;;  %v1395_v11 = vadd.f32 %v2165_v7, %v1394_v8  ;;  %v1433_v59 = vor.u32 1.1754944e-38, %v1432_v6  ;;  %vm1431_vm1 = vcmp.eq.f32.partialorder %v1430_v32, 8.507059e+37 }
 0x5c2   :  { %v1422_v53 = vmul.f32 %v1716_v45, %v2163_v61  ;;  %v2249_v34 = vpop.eup %1717  ;;  %vm1427_vm15 = vweird.f32 %v1716_v45  ;;  %v1350_v51 = vadd.f32 %v2115_v46, %v1349_v62  ;;  %v1403_v61 = vor.u32 1.1754944e-38, %v1402_v33 }
 0x5c3   :  { %v1410_v36 = vadd.f32 %v2197_v43, %v1409_v37  ;;  %v2260_v4 = vpop.eup %1719  ;;  %v1287_v44 = vmul.f32 %v2249_v34, %v2171_v3  ;;  %vm1428_vm12 = vmor %vm1426_vm11, %vm1427_vm15  ;;  %v1243_v33 = vsub.f32 1.0, %v2229_v18  ;;  %v1258_v62 = vsub.f32 1.0, %v2235_v1 }
 0x5c4   :  { %v1423_v30 = vsub.f32 1.0, %v1422_v53  ;;  %v1380_v53 = vadd.f32 %v2137_v26, %v1379_v12  ;;  %v1272_v39 = vmul.f32 %v2260_v4, %v2195_v24  ;;  %v2580_v18 = vand.u32 2147483647, %v2087_v17 }
 0x5c5   :  { %v1414_v40 = vsel %vm2274_vm2, %v2197_v43, %v1410_v36  ;;  %vm2305_vm2 = vmor %vm1381_vm7, %vm1382_vm8  ;;  %vm1386_vm8 = vcmp.eq.f32.partialorder %v1385_v27, 8.507059e+37  ;;  %v2581_v1 = vsel %vm2216_vm5, %v2092_v16, %v2192_v13  ;;  %vm1291_vm11 = vweird.f32 %v2171_v3 }
 0x5c6   :  { %v1424_v37 = vmul.f32 %v1716_v45, %v1423_v30  ;;  %v1400_v30 = vand.u32 2147483647, %v2113_v57  ;;  %v1399_v57 = vsel %vm2284_vm4, %v2165_v7, %v1395_v11  ;;  %v1419_v43 = vsel %vm1416_vm13, %v1418_v63, %v1414_v40  ;;  %vm2319_vm7 = vmor %vm1366_vm10, %vm1367_vm6 }
 0x5c7   :  { %v1384_v11 = vsel %vm2305_vm2, %v2137_v26, %v1380_v53  ;;  %v1288_v7 = vsub.f32 1.0, %v1287_v44  ;;  %v1388_v63 = vor.u32 1.1754944e-38, %v1387_v21  ;;  %v1369_v44 = vsel %vm2319_vm7, %v2130_v31, %v1365_v56  ;;  %vm2332_vm6 = vmor %vm1351_vm14, %vm1352_vm9 }
 0x5c8   :  { %v1425_v48 = vadd.f32 %v1716_v45, %v1424_v37  ;;  %vm1401_vm15 = vcmp.eq.f32.partialorder %v1400_v30, 8.507059e+37  ;;  %v1273_v26 = vsub.f32 1.0, %v1272_v39  ;;  %v2579_v21 = vand.u32 2147483648, %v2087_v17 }
 0x5c9   :  { %v1389_v39 = vsel %vm1386_vm8, %v1388_v63, %v1384_v11  ;;  %vm1246_vm10 = vweird.f32 %v2111_v52  ;;  %vm1371_vm4 = vcmp.eq.f32.partialorder %v2580_v18, 8.507059e+37  ;;  %v1344_v36 = vsel %vm2278_vm3, %v2207_v29, %v2581_v1 }
 0x5ca   :  { %v1429_v55 = vsel %vm1428_vm12, %v1716_v45, %v1425_v48  ;;  %v1355_v48 = vand.u32 2147483647, %v2076_v2  ;;  %v1357_v45 = vand.u32 2147483648, %v2076_v2  ;;  %v1373_v31 = vor.u32 1.1754944e-38, %v2579_v21 }
 0x5cb   :  { %v1434_v6 = vsel %vm1431_vm1, %v1433_v59, %v1429_v55  ;;  %v1404_v59 = vsel %vm1401_vm15, %v1403_v61, %v1399_v57  ;;  %v1289_v2 = vmul.f32 %v2249_v34, %v1288_v7  ;;  %vm1231_vm14 = vweird.f32 %v2062_v60 }
 0x5cc   :  { %v1451_v32 = vmul.f32 %v1434_v6, %v2090_v20  ;;  %v1450_v20 = vmul.f32 %v1419_v43, %v2059_v58  ;;  %v1354_v58 = vsel %vm2332_vm6, %v2115_v46, %v1350_v51  ;;  %v1449_v27 = vmul.f32 %v1404_v59, %v2042_v35  ;;  %v1721_v51 = vld [vmem:[#allocation2 + $0x120] sm:$0xff]  ;;  %v2616_v59 = vld [vmem:[#allocation5_spill] sm:$0xff] }
 0x5cd   :  { %vm1356_vm9 = vcmp.eq.f32.partialorder %v1355_v48, 8.507059e+37  ;;  %v1358_v38 = vor.u32 1.1754944e-38, %v1357_v45  ;;  %v1374_v46 = vsel %vm1371_vm4, %v1373_v31, %v1369_v44  ;;  %v1274_v17 = vmul.f32 %v2260_v4, %v1273_v26 }
 0x5ce   :  { %1468 = vmatpush.msra.mxu3 %v1451_v32  ;;  %v1448_v50 = vmul.f32 %v1389_v39, %v2030_v22  ;;  %vm1292_vm12 = vweird.f32 %v2249_v34  ;;  %v1259_v16 = vmul.f32 %v2205_v42, %v1258_v62  ;;  %vm1276_vm5 = vweird.f32 %v2195_v24  ;;  %v2590_v32 = vld [vmem:[#allocation20_spill] sm:$0xff]  ;;  %v2597_v62 = vld [vmem:[#allocation21_spill] sm:$0xff] }
 0x5cf   :  { %v1359_v35 = vsel %vm1356_vm9, %v1358_v38, %v1354_v58  ;;  %v1297_v13 = vand.u32 2147483648, %v2171_v3  ;;  %vm1216_vm3 = vweird.f32 %v2049_v49  ;;  %vm1217_vm13 = vweird.f32 %v2083_v9  ;;  %vm2376_vm15 = vmor %vm1291_vm11, %vm1292_vm12  ;;  %v2603_v38 = vld [vmem:[#allocation15_spill] sm:$0xff] }
 0x5d0   :  { %1469 = vmatpush.msra.mxu3 %v1450_v20  ;;  %v1447_v29 = vmul.f32 %v1374_v46, %v2027_v23  ;;  %vm1277_vm1 = vweird.f32 %v2260_v4  ;;  %v1290_v22 = vadd.f32 %v2249_v34, %v1289_v2  ;;  %v1244_v37 = vmul.f32 %v2186_v19, %v1243_v33  ;;  %v2595_v20 = vld [vmem:[#allocation9_spill] sm:$0xff]  ;;  %v2596_v33 = vld [vmem:[#allocation19_spill] sm:$0xff] }
 0x5d1   :  { %vm1261_vm2 = vweird.f32 %v2124_v10  ;;  %v1282_v53 = vand.u32 2147483648, %v2195_v24  ;;  %vm1201_vm7 = vweird.f32 %v2046_v47  ;;  %vm1202_vm8 = vweird.f32 %v2080_v41  ;;  %vm2393_vm9 = vmor %vm1276_vm5, %vm1277_vm1 }
 0x5d2   :  { %1470 = vmatpush.msra.mxu3 %v1449_v27  ;;  %v1446_v23 = vmul.f32 %v1359_v35, %v2025_v15  ;;  %vm1262_vm6 = vweird.f32 %v2205_v42  ;;  %v1275_v12 = vadd.f32 %v2260_v4, %v1274_v17  ;;  %v1280_v30 = vand.u32 2147483647, %v2195_v24  ;;  %v1722_v24 = vld [vmem:[#allocation2 + $0x130] sm:$0xff]  ;;  %v2602_v27 = vld [vmem:[#allocation18_spill] sm:$0xff] }
 0x5d3   :  { %v1762_v40 = vmov 7   ;;  %v1445_v3 = vmul.f32 %v1344_v36, %v2017_v0  ;;  %vm1247_vm4 = vweird.f32 %v2186_v19  ;;  %v1267_v56 = vand.u32 2147483648, %v2124_v10  ;;  %vm2413_vm5 = vmor %vm1261_vm2, %vm1262_vm6 }
 0x5d4   :  { %1471 = vmatpush.msra.mxu3 %v1448_v50  ;;  %1616 = vset.pattern.permute.xlu0 %v1762_v40  ;;  %v1298_v57 = vor.u32 1.1754944e-38, %v1297_v13  ;;  %v1260_v54 = vadd.f32 %v2205_v42, %v1259_v16  ;;  %v1265_v0 = vand.u32 2147483647, %v2124_v10  ;;  %v1294_v61 = vsel %vm2376_vm15, %v2249_v34, %v1290_v22  ;;  %v1723_v10 = vld [vmem:[#allocation2 + $0x128] sm:$0xff]  ;;  %vm2431_vm2 = vmor %vm1246_vm10, %vm1247_vm4  ;;  %v2606_v16 = vld [vmem:[#allocation17_spill] sm:$0xff] }
 0x5d5   :  { %1453 = vperm.xlu0 %1616, %v1721_v51   ;;  %1618 = vset.pattern.permute.xlu1 %v1762_v40  ;;  %vm2402_vm11 = vcmp.eq.f32.partialorder %v1295_v14, 8.507059e+37  ;;  %v1250_v6 = vand.u32 2147483647, %v2111_v52  ;;  %v1252_v11 = vand.u32 2147483648, %v2111_v52  ;;  %vm1232_vm12 = vweird.f32 %v2098_v25  ;;  %v2607_v22 = vld [vmem:[#allocation16_spill] sm:$0xff] }
 0x5d6   :  { %1472 = vmatpush.msra.mxu3 %v1447_v29  ;;  %1461 = vperm.xlu1 %1618, %v1722_v24   ;;  %v1283_v34 = vor.u32 1.1754944e-38, %v1282_v53  ;;  %v1444_v48 = vmul.f32 %v2590_v32, %v2009_v28  ;;  %v1245_v45 = vadd.f32 %v2186_v19, %v1244_v37  ;;  %v1279_v5 = vsel %vm2393_vm9, %v2260_v4, %v1275_v12  ;;  %vm2456_vm15 = vmor %vm1231_vm14, %vm1232_vm12  ;;  %v1724_v12 = vld [vmem:[#allocation2 + $0x138] sm:$0xff]  ;;  %v27_v24 = vld [vmem:[#allocation2] sm:$0xff] }
 0x5d7   :  { %1617 = vset.pattern.permute.xlu2 %v1762_v40  ;;  %vm2423_vm1 = vcmp.eq.f32.partialorder %v1280_v30, 8.507059e+37  ;;  %v1235_v28 = vand.u32 2147483647, %v2062_v60  ;;  %v1237_v44 = vand.u32 2147483648, %v2062_v60  ;;  %v1268_v4 = vor.u32 1.1754944e-38, %v1267_v56  ;;  %vm2474_vm14 = vmor %vm1216_vm3, %vm1217_vm13 }
 0x5d8   :  { %1473 = vmatpush.msra.mxu3 %v1446_v23  ;;  %1457 = vperm.xlu2 %1617, %v1723_v10   ;;  %v1299_v26 = vsel %vm2402_vm11, %v1298_v57, %v1294_v61  ;;  %v1443_v55 = vmul.f32 %v2596_v33, %v2595_v20  ;;  %v1230_v21 = vadd.f32 %v2098_v25, %v2597_v62  ;;  %vm2446_vm10 = vcmp.eq.f32.partialorder %v1265_v0, 8.507059e+37  ;;  %vm2490_vm3 = vmor %vm1201_vm7, %vm1202_vm8  ;;  %v2612_v57 = vld [vmem:[#allocation12_spill] sm:$0xff]  ;;  %v2614_v61 = vld [vmem:[#allocation10_spill] sm:$0xff] }
 0x5d9   :  { %v1264_v52 = vsel %vm2413_vm5, %v2205_v42, %v1260_v54  ;;  %v1220_v39 = vand.u32 2147483647, %v2049_v49  ;;  %v1222_v58 = vand.u32 2147483648, %v2049_v49  ;;  %v1253_v18 = vor.u32 1.1754944e-38, %v1252_v11  ;;  %v2613_v54 = vld [vmem:[#allocation11_spill] sm:$0xff]  ;;  %v30_v11 = vld [vmem:[#allocation2 + $0x18] sm:$0xff] }
 0x5da   :  { %1474 = vmatpush.msra.mxu3 %v1445_v3  ;;  %v1284_v42 = vsel %vm2423_vm1, %v1283_v34, %v1279_v5  ;;  %v1215_v1 = vadd.f32 %v2083_v9, %v2602_v27  ;;  %v1249_v36 = vsel %vm2431_vm2, %v2186_v19, %v1245_v45  ;;  %vm1251_vm6 = vcmp.eq.f32.partialorder %v1250_v6, 8.507059e+37  ;;  %v2611_v3 = vld [vmem:[#allocation13_spill] sm:$0xff]  ;;  %v28_v6 = vld [vmem:[#allocation2 + $0x8] sm:$0xff]  ;;  %v2617_v20 = vld [vmem:[#allocation7_spill] sm:$0xff] }
 0x5db   :  { %v1442_v46 = vmul.f32 %v1299_v26, %v2603_v38  ;;  %v1205_v60 = vand.u32 2147483647, %v2046_v47  ;;  %v1207_v17 = vand.u32 2147483648, %v2046_v47  ;;  %v1238_v35 = vor.u32 1.1754944e-38, %v1237_v44 }
 0x5dc   :  { %1475 = vmatpush.msra.mxu3 %v1444_v48  ;;  %v1269_v19 = vsel %vm2446_vm10, %v1268_v4, %v1264_v52  ;;  %v1200_v13 = vadd.f32 %v2080_v41, %v2606_v16  ;;  %v1234_v29 = vsel %vm2456_vm15, %v2098_v25, %v1230_v21  ;;  %vm1236_vm4 = vcmp.eq.f32.partialorder %v1235_v28, 8.507059e+37  ;;  %v2610_v25 = vld [vmem:[#allocation14_spill] sm:$0xff]  ;;  %v2618_v52 = vld [vmem:[#allocation8_spill] sm:$0xff] }
 0x5dd   :  { %v1441_v14 = vmul.f32 %v1284_v42, %v2607_v22  ;;  %v1223_v37 = vor.u32 1.1754944e-38, %v1222_v58  ;;  %v1254_v53 = vsel %vm1251_vm6, %v1253_v18, %v1249_v36  ;;  %v1219_v8 = vsel %vm2474_vm14, %v2083_v9, %v1215_v1  ;;  %v2615_v48 = vld [vmem:[#allocation6_spill] sm:$0xff] }
 0x5de   :  { %1476 = vmatpush.msra.mxu3 %v1443_v55  ;;  %vm1221_vm13 = vcmp.eq.f32.partialorder %v1220_v39, 8.507059e+37  ;;  %v1440_v23 = vmul.f32 %v1269_v19, %v2610_v25  ;;  %v1208_v30 = vor.u32 1.1754944e-38, %v1207_v17  ;;  %v1239_v40 = vsel %vm1236_vm4, %v1238_v35, %v1234_v29 }
 0x5df   :  { %v1204_v47 = vsel %vm2490_vm3, %v2080_v41, %v1200_v13  ;;  %vm1206_vm7 = vcmp.eq.f32.partialorder %v1205_v60, 8.507059e+37  ;;  %v1439_v56 = vmul.f32 %v1254_v53, %v2611_v3  ;;  %v1224_v15 = vsel %vm1221_vm13, %v1223_v37, %v1219_v8  ;;  %v29_v41 = vld [vmem:[#allocation2 + $0x10] sm:$0xff] }
 0x5e0   :  { %1477 = vmatpush.msra.mxu3 %v1442_v46  ;;  %1465 = vperm.xlu2 %1617, %v1724_v12   ;;  %v1438_v51 = vmul.f32 %v1239_v40, %v2612_v57  ;;  %v1209_v9 = vsel %vm1206_vm7, %v1208_v30, %v1204_v47  ;;  %v1437_v0 = vmul.f32 %v1224_v15, %v2613_v54 }
 0x5e1   :  { %v1436_v43 = vmul.f32 %v1209_v9, %v2614_v61 }
 0x5e2   :  { %1478 = vmatpush.msra.mxu3 %v1441_v14 }
 0x5e4   :  { %1479 = vmatpush.msra.mxu3 %v1440_v23 }
 0x5e6   :  { %1480 = vmatpush.msra.mxu3 %v1439_v56 }
 0x5e8   :  { %1481 = vmatpush.msra.mxu3 %v1438_v51 }
 0x5ea   :  { %1482 = vmatpush.msra.mxu3 %v1437_v0 }
 0x5ec   :  { %1483 = vmatpush.msra.mxu3 %v1436_v43 }
 0x5ed   :  { %1484 = vmatmul.f32.vlgmr.msra.gmra.mxu3 %v27_v24 }
 0x5f5   :  { %1487 = vmatmul.f32.gmra.mxu3 %v28_v6 }
 0x5fd   :  { %1490 = vmatmul.f32.gmra.mxu3 %v29_v41 }
 0x605   :  { %1493 = vmatmul.f32.gmra.mxu3 %v30_v11 }
 0x632   :  { %v1458_v5 = vpop.permute.xlu2 %1457 }
 0x63a   :  { %v1466_v55 = vpop.permute.xlu2 %1465 }
 0x647   :  { %v1454_v7 = vpop.permute.xlu0 %1453 }
 0x648   :  { %v1462_v44 = vpop.permute.xlu1 %1461 }
 0x670   :  { %v1485_v34 = vpop.f32.mrf.mxu3 }
 0x671   :  { %v1486_v32 = vadd.f32 %v1485_v34, %v1454_v7 }
 0x673   :  { %v1497_v45 = vadd.f32 %v1486_v32, %v2615_v48 }
 0x675   :  { %1501 = vst.msk [vmem:[%s2527_s2] sm:$0xff] %vm85_vm0, %v1497_v45 }
 0x678   :  { %v1488_v63 = vpop.f32.mrf.mxu3 }
 0x679   :  { %v1489_v10 = vadd.f32 %v1488_v63, %v1458_v5 }
 0x67b   :  { %v1498_v28 = vadd.f32 %v1489_v10, %v2616_v59 }
 0x67d   :  { %1502 = vst.msk [vmem:[%s2527_s2 + $0x8] sm:$0xff] %vm85_vm0, %v1498_v28 }
 0x680   :  { %v1491_v4 = vpop.f32.mrf.mxu3 }
 0x681   :  { %v1492_v26 = vadd.f32 %v1491_v4, %v1462_v44 }
 0x683   :  { %v1499_v33 = vadd.f32 %v1492_v26, %v2617_v20 }
 0x685   :  { %1503 = vst.msk [vmem:[%s2527_s2 + $0x10] sm:$0xff] %vm85_vm0, %v1499_v33 }
 0x688   :  { %v1494_v62 = vpop.f32.mrf.mxu3 }
 0x689   :  { %v1495_v21 = vadd.f32 %v1494_v62, %v1466_v55 }
 0x68b   :  { %v1500_v31 = vadd.f32 %v1495_v21, %v2618_v52 }
 0x68d   :  { %1504 = vst.msk [vmem:[%s2527_s2 + $0x18] sm:$0xff] %vm85_vm0, %v1500_v31 }
 0x68e   :  { %1509 = vsyncpa [#allocation3], 1 }

</bundles_post_ra>
